<compile_context>
chip_gen: v6e
topology: v6e:2x2x1
jax: 0.10.0
libtpu: 0.0.40
codegen_flags: <defaults>
</compile_context>

<pallas_src>
import functools

import jax
import jax.numpy as jnp
from jax.experimental import pallas as pl
from jax.experimental.pallas import tpu as pltpu

EPS = 1e-5          # nn.BatchNorm2d default eps
NEG_SLOPE = 0.2     # LeakyReLU(0.2)
LANES = 128
_MiB = 1024 * 1024
_VMEM_MARGIN = 8 * _MiB   # headroom for Mosaic internals / semaphores


def _round_up(x, m):
    return ((x + m - 1) // m) * m


def _vmem_cap_bytes():
    """~3/4 of physical VMEM (96 MiB on v5e/v6e, 48 MiB on v7x); safe fallback."""
    try:
        phys = int(pltpu.get_tpu_info().vmem_capacity_bytes)
    except Exception:                      # no TPU visible at trace time / API drift
        phys = 64 * _MiB                   # assume the smallest (v7x per-TC VMEM)
    return min(96 * _MiB, max(32 * _MiB, (phys * 3) // 4))


def _pass1_vmem_bytes(row_tile, kp, c, in_bytes, y_bytes):
    return (2 * row_tile * kp * in_bytes   # patches block (double-buffered)
            + 2 * kp * c * in_bytes        # weights block (see Buffered(1) TODO)
            + 2 * row_tile * c * y_bytes   # conv-row output block
            + 2 * 2 * c * 4)               # per-tile stats output block


def _pass2_vmem_bytes(row_tile, c, y_bytes, out_bytes):
    return 2 * row_tile * c * (y_bytes + out_bytes) + 4 * 2 * c * 4


def _conv_stats_kernel(p_ref, w_ref, y_ref, s_ref):
    # p_ref: (TR, Kp)  im2col patch rows, already in the MXU input dtype.
    # w_ref: (Kp, C)   packed conv weights.
    # y_ref: (TR, C)   conv output rows (HBM format: bf16 when compute is bf16).
    # s_ref: (2, C)    per-tile partial stats: row 0 = sum, row 1 = sum of squares.
    y = jnp.dot(p_ref[...], w_ref[...], preferred_element_type=jnp.float32)
    y_ref[...] = y.astype(y_ref.dtype)
    # Stats are computed from the f32 matmul result `y`, not the (possibly
    # bf16) stored copy, so batch statistics carry no quantization bias.
    s_ref[0:1, :] = jnp.sum(y, axis=0, keepdims=True)
    s_ref[1:2, :] = jnp.sum(y * y, axis=0, keepdims=True)


def _bn_act_kernel(y_ref, scale_ref, shift_ref, o_ref):
    # Elementwise math in f32 regardless of the HBM dtype of y (v5e has no
    # bf16 VPU path); bf16 only shrinks the bytes on the wire.
    z = y_ref[...].astype(jnp.float32) * scale_ref[...] + shift_ref[...]
    o_ref[...] = jnp.where(z > 0, z, NEG_SLOPE * z).astype(o_ref.dtype)


def single_conv(x, w_oihw, gamma, beta, *, row_tile=512, bn_row_tile=1024,
                compute_dtype=jnp.float32, data_format="NCHW"):
    """SingleConv forward.

    x: (N,Cin,H,W) if data_format=="NCHW" (PyTorch layout) or (N,H,W,Cin) if
       "NHWC" (preferred when chaining SingleConvs: avoids two full-tensor
       transpose passes per layer).  Output uses the same layout as the input.
    w_oihw: (Cout,Cin,3,3) PyTorch conv weight.  gamma/beta: (Cout,) BN affine.
    """
    if data_format == "NCHW":
        N, Cin, H, W = x.shape
        x = jnp.transpose(x, (0, 2, 3, 1))
    elif data_format == "NHWC":
        N, H, W, Cin = x.shape
    else:
        raise ValueError(f"unknown data_format: {data_format}")
    Cout = w_oihw.shape[0]

    use_bf16 = compute_dtype == jnp.bfloat16
    in_dtype = jnp.bfloat16 if use_bf16 else jnp.float32
    in_bytes = 2 if use_bf16 else 4
    y_dtype, y_bytes = in_dtype, in_bytes       # HBM format of the intermediate y

    K = 9 * Cin
    # Lane-pad K (patch lane dim / weight sublane dim).  For tiny Cin a full 128
    # pad would inflate the dominant HBM operand, so only round small K to 16.
    Kp = _round_up(K, LANES) if K >= LANES else _round_up(K, 16)
    C = _round_up(Cout, LANES)
    # TODO(synk): on v6e/v7x pad C to 256 when the layer is compute-bound
    # (K >= ~1k, Cout just above a 128 boundary) to fill the 256-wide MXU.
    R = N * H * W

    # ---- tile sizing + per-generation VMEM budget ----
    cap = _vmem_cap_bytes()
    max_rows = _round_up(R, 128)
    row_tile = max(128, min(_round_up(int(row_tile), 128), max_rows))
    while (row_tile > 128 and
           _pass1_vmem_bytes(row_tile, Kp, C, in_bytes, y_bytes) + _VMEM_MARGIN > cap):
        row_tile = max(128, row_tile // 2)
    mult = max(1, int(bn_row_tile) // row_tile)            # pass-2 tile = mult * row_tile
    mult = min(mult, pl.cdiv(max_rows, row_tile))
    while mult > 1 and _pass2_vmem_bytes(mult * row_tile, C, y_bytes, 4) + _VMEM_MARGIN > cap:
        mult -= 1
    bn_row_tile = mult * row_tile

    R_pad = _round_up(R, bn_row_tile)                       # multiple of both tiles
    num_tiles = R_pad // row_tile
    num_bn_tiles = R_pad // bn_row_tile

    limit1 = int(min(cap, max(32 * _MiB,
                              _pass1_vmem_bytes(row_tile, Kp, C, in_bytes, y_bytes)
                              + _VMEM_MARGIN)))
    limit2 = int(min(cap, max(32 * _MiB,
                              _pass2_vmem_bytes(bn_row_tile, C, y_bytes, 4)
                              + _VMEM_MARGIN)))

    # ---- im2col in the wrapper (XLA fuses pad + shifted slices + concat) ----
    # Cast to the MXU input dtype BEFORE materializing the 9x-expanded patch
    # array so pass-1 HBM reads (and the im2col intermediate) are already narrow.
    # TODO(synk): for Cin >= ~64 move im2col into the kernel via halo-tile DMA
    # (memory_space=pl.ANY + make_async_copy of a (tile_h+2, W+2, Cin) NHWC slab)
    # with 9 accumulating K=Cin matmuls, dropping the 9x-expanded HBM array.
    x = x.astype(in_dtype)
    xp = jnp.pad(x, ((0, 0), (1, 1), (1, 1), (0, 0)))                 # padding=1
    cols = [xp[:, kh:kh + H, kw:kw + W, :] for kh in range(3) for kw in range(3)]
    patches = jnp.concatenate(cols, axis=-1).reshape(R, K)            # (R, 9*Cin)
    if R_pad != R or Kp != K:
        patches = jnp.pad(patches, ((0, R_pad - R), (0, Kp - K)))

    # Packed weights (Kp, C); row index = (kh*3+kw)*Cin + cin, matching the concat.
    w = jnp.transpose(w_oihw, (2, 3, 1, 0)).reshape(K, Cout).astype(jnp.float32)
    w = jnp.pad(w, ((0, Kp - K), (0, C - Cout))).astype(in_dtype)

    # ---- pass 1: single-matmul conv + per-tile partial BN statistics ----
    y, stats = pl.pallas_call(
        _conv_stats_kernel,
        grid=(num_tiles,),
        in_specs=[
            pl.BlockSpec((row_tile, Kp), lambda i: (i, 0)),
            # TODO(synk): request single-buffering for the constant-index weight
            # block (pipeline_mode=pl.Buffered(1)) once verified on all
            # generations; the second buffer is pure VMEM waste.
            pl.BlockSpec((Kp, C), lambda i: (0, 0)),
        ],
        out_specs=[
            pl.BlockSpec((row_tile, C), lambda i: (i, 0)),
            pl.BlockSpec((None, 2, C), lambda i: (i, 0, 0)),
        ],
        out_shape=[
            jax.ShapeDtypeStruct((R_pad, C), y_dtype),
            jax.ShapeDtypeStruct((num_tiles, 2, C), jnp.float32),
        ],
        compiler_params=pltpu.CompilerParams(
            dimension_semantics=("parallel",),
            vmem_limit_bytes=limit1),
    )(patches, w)

    # ---- per-channel BN stat math (tiny: O(Cout)), done in the wrapper ----
    # Padded rows are all-zero patches -> contribute 0 to both partial sums,
    # so dividing by the true row count R gives exact batch statistics.
    s1 = jnp.sum(stats[:, 0, :], axis=0)
    s2 = jnp.sum(stats[:, 1, :], axis=0)
    mean = s1 / R
    # TODO(synk): E[y^2]-mean^2 in f32 (clamped); switch to a centered two-pass
    # variance reduction over `y` if BN inputs can have |mean| >> std.
    var = jnp.maximum(s2 / R - mean * mean, 0.0)
    inv = jax.lax.rsqrt(var + EPS)
    g = jnp.pad(gamma.astype(jnp.float32), (0, C - Cout))
    b = jnp.pad(beta.astype(jnp.float32), (0, C - Cout))
    scale = (g * inv)[None, :]                     # (1, C)
    shift = (b - mean * g * inv)[None, :]          # (1, C)

    # ---- pass 2: fused BN scale/shift + LeakyReLU over lane-dense row tiles ----
    out2d = pl.pallas_call(
        _bn_act_kernel,
        grid=(num_bn_tiles,),
        in_specs=[
            pl.BlockSpec((bn_row_tile, C), lambda i: (i, 0)),
            pl.BlockSpec((1, C), lambda i: (0, 0)),
            pl.BlockSpec((1, C), lambda i: (0, 0)),
        ],
        out_specs=pl.BlockSpec((bn_row_tile, C), lambda i: (i, 0)),
        out_shape=jax.ShapeDtypeStruct((R_pad, C), jnp.float32),
        compiler_params=pltpu.CompilerParams(
            dimension_semantics=("parallel",),
            vmem_limit_bytes=limit2),
    )(y, scale, shift)

    out = out2d[:R, :Cout].reshape(N, H, W, Cout)
    if data_format == "NCHW":
        out = jnp.transpose(out, (0, 3, 1, 2))     # back to PyTorch layout
    return out


def _reference(x_nchw, w_oihw, gamma, beta):
    # Pure-JAX reference for validation.
    y = jax.lax.conv_general_dilated(
        x_nchw, w_oihw, window_strides=(1, 1), padding=((1, 1), (1, 1)),
        dimension_numbers=("NCHW", "OIHW", "NCHW"))
    mean = jnp.mean(y, axis=(0, 2, 3), keepdims=True)
    var = jnp.var(y, axis=(0, 2, 3), keepdims=True)
    y = (y - mean) * jax.lax.rsqrt(var + EPS)
    y = y * gamma.reshape(1, -1, 1, 1) + beta.reshape(1, -1, 1, 1)
    return jnp.where(y > 0, y, NEG_SLOPE * y)


if __name__ == "__main__":
    key = jax.random.PRNGKey(0)
    kx, kw = jax.random.split(key)

    N, Cin, Cout, H, W = 2, 4, 8, 16, 16

    x = jax.random.normal(kx, (N, Cin, H, W), dtype=jnp.float32)

    # Kaiming normal init (fan_in, leaky_relu a=0 -> gain=sqrt(2)), bias=False.
    fan_in = Cin * 3 * 3
    std = (2.0 / fan_in) ** 0.5
    w = std * jax.random.normal(kw, (Cout, Cin, 3, 3), dtype=jnp.float32)

    # BatchNorm2d default affine init: gamma=1, beta=0.
    gamma = jnp.ones((Cout,), dtype=jnp.float32)
    beta = jnp.zeros((Cout,), dtype=jnp.float32)

    ref = jax.block_until_ready(_reference(x, w, gamma, beta))

    # f32 MXU inputs: tight correctness check.
    out = jax.block_until_ready(jax.jit(single_conv)(x, w, gamma, beta))
    assert out.shape == (N, Cout, H, W)
    assert jnp.max(jnp.abs(out - ref)) < 1e-4

    # bf16 HBM/MXU format (patches, weights, intermediate y), f32 accumulation
    # and f32 BN/LeakyReLU math: loose check.
    out_bf16 = jax.block_until_ready(
        jax.jit(functools.partial(single_conv, compute_dtype=jnp.bfloat16))(
            x, w, gamma, beta))
    assert out_bf16.shape == (N, Cout, H, W)
    assert jnp.max(jnp.abs(out_bf16 - ref)) < 1e-1

    # NHWC end-to-end path (no boundary transposes), as used when chained.
    x_nhwc = jnp.transpose(x, (0, 2, 3, 1))
    out_nhwc = jax.block_until_ready(
        jax.jit(functools.partial(single_conv, data_format="NHWC"))(
            x_nhwc, w, gamma, beta))
    assert out_nhwc.shape == (N, H, W, Cout)
    assert jnp.max(jnp.abs(jnp.transpose(out_nhwc, (0, 3, 1, 2)) - ref)) < 1e-4

    print("KERNEL_OK")
</pallas_src>

<mosaic_0001>
module attributes {stable_mosaic.version = 11 : i64} {
  func.func @_conv_stats_kernel(%arg0: i32, %arg1: memref<512x48xf32, #tpu.memory_space<vmem>>, %arg2: memref<48x128xf32, #tpu.memory_space<vmem>>, %arg3: memref<512x128xf32, #tpu.memory_space<vmem>>, %arg4: memref<1x2x128xf32, #tpu.memory_space<vmem>>) attributes {dimension_semantics = [#tpu.dimension_semantics<parallel>], iteration_bounds = array<i64: 1>, scalar_prefetch = 0 : i64, scratch_operands = 0 : i64, tpu.core_type = #tpu.core_type<tc>, window_params = [{transform_indices = @transform_0, window_bounds = array<i64: 512, 48>}, {pipeline_mode = #tpu.pipeline_mode<synchronous>, transform_indices = @transform_1, window_bounds = array<i64: 48, 128>}, {transform_indices = @transform_2, window_bounds = array<i64: 512, 128>}, {transform_indices = @transform_3, window_bounds = array<i64: 1, 2, 128>}]} {
    %c0 = arith.constant 0 : index
    %c0_0 = arith.constant 0 : index
    %0 = vector.load %arg1[%c0, %c0_0] : memref<512x48xf32, #tpu.memory_space<vmem>>, vector<512x48xf32>
    %c0_1 = arith.constant 0 : index
    %c0_2 = arith.constant 0 : index
    %1 = vector.load %arg2[%c0_1, %c0_2] : memref<48x128xf32, #tpu.memory_space<vmem>>, vector<48x128xf32>
    %cst = arith.constant dense<0.000000e+00> : vector<512x128xf32>
    %2 = tpu.matmul %0, %1, %cst {dimension_numbers = #tpu.dot_dimension_numbers<[1], [0], [0], [1], [0, 0, 1, 1], [], []>} : vector<512x48xf32>, vector<48x128xf32>, vector<512x128xf32> -> vector<512x128xf32>
    %c0_3 = arith.constant 0 : index
    %c0_4 = arith.constant 0 : index
    %3 = vector.load %arg3[%c0_3, %c0_4] : memref<512x128xf32, #tpu.memory_space<vmem>>, vector<512x128xf32>
    tpu.vector_store %arg3[%c0_3, %c0_4], %2 {strides = array<i32>} : memref<512x128xf32, #tpu.memory_space<vmem>>, vector<512x128xf32>,
    %cst_5 = arith.constant dense<0.000000e+00> : vector<128xf32>
    %4 = vector.multi_reduction <add>, %2, %cst_5 [0] : vector<512x128xf32> to vector<128xf32>
    %5 = vector.shape_cast %4 : vector<128xf32> to vector<1x128xf32>
    %c0_6 = arith.constant 0 : index
    %c0_7 = arith.constant 0 : index
    %c0_8 = arith.constant 0 : index
    %6 = vector.load %arg4[%c0_6, %c0_7, %c0_8] : memref<1x2x128xf32, #tpu.memory_space<vmem>>, vector<1x1x128xf32>
    %7 = vector.shape_cast %6 : vector<1x1x128xf32> to vector<1x128xf32>
    %8 = vector.shape_cast %5 : vector<1x128xf32> to vector<1x1x128xf32>
    tpu.vector_store %arg4[%c0_6, %c0_7, %c0_8], %8 {strides = array<i32>} : memref<1x2x128xf32, #tpu.memory_space<vmem>>, vector<1x1x128xf32>,
    %9 = arith.mulf %2, %2 : vector<512x128xf32>
    %cst_9 = arith.constant dense<0.000000e+00> : vector<128xf32>
    %10 = vector.multi_reduction <add>, %9, %cst_9 [0] : vector<512x128xf32> to vector<128xf32>
    %11 = vector.shape_cast %10 : vector<128xf32> to vector<1x128xf32>
    %c0_10 = arith.constant 0 : index
    %c1 = arith.constant 1 : index
    %c0_11 = arith.constant 0 : index
    %12 = vector.load %arg4[%c0_10, %c1, %c0_11] : memref<1x2x128xf32, #tpu.memory_space<vmem>>, vector<1x1x128xf32>
    %13 = vector.shape_cast %12 : vector<1x1x128xf32> to vector<1x128xf32>
    %14 = vector.shape_cast %11 : vector<1x128xf32> to vector<1x1x128xf32>
    tpu.vector_store %arg4[%c0_10, %c1, %c0_11], %14 {strides = array<i32>} : memref<1x2x128xf32, #tpu.memory_space<vmem>>, vector<1x1x128xf32>,
    return
  }
  func.func @transform_0(%arg0: i32) -> (i32, i32) {
    %c0_i32 = arith.constant 0 : i32
    %c0_i32_0 = arith.constant 0 : i32
    return %arg0, %c0_i32 : i32, i32
  }
  func.func @transform_1(%arg0: i32) -> (i32, i32) {
    %c0_i32 = arith.constant 0 : i32
    %c0_i32_0 = arith.constant 0 : i32
    %c0_i32_1 = arith.constant 0 : i32
    return %c0_i32, %c0_i32_0 : i32, i32
  }
  func.func @transform_2(%arg0: i32) -> (i32, i32) {
    %c0_i32 = arith.constant 0 : i32
    %c0_i32_0 = arith.constant 0 : i32
    return %arg0, %c0_i32 : i32, i32
  }
  func.func @transform_3(%arg0: i32) -> (i32, i32, i32) {
    %c0_i32 = arith.constant 0 : i32
    %c0_i32_0 = arith.constant 0 : i32
    %c0_i32_1 = arith.constant 0 : i32
    return %arg0, %c0_i32, %c0_i32_0 : i32, i32, i32
  }
}

module attributes {stable_mosaic.version = 11 : i64} {
  func.func @_bn_act_kernel(%arg0: i32, %arg1: memref<512x128xf32, #tpu.memory_space<vmem>>, %arg2: memref<1x128xf32, #tpu.memory_space<vmem>>, %arg3: memref<1x128xf32, #tpu.memory_space<vmem>>, %arg4: memref<512x128xf32, #tpu.memory_space<vmem>>) attributes {dimension_semantics = [#tpu.dimension_semantics<parallel>], iteration_bounds = array<i64: 1>, scalar_prefetch = 0 : i64, scratch_operands = 0 : i64, tpu.core_type = #tpu.core_type<tc>, window_params = [{transform_indices = @transform_0, window_bounds = array<i64: 512, 128>}, {pipeline_mode = #tpu.pipeline_mode<synchronous>, transform_indices = @transform_1, window_bounds = array<i64: 1, 128>}, {pipeline_mode = #tpu.pipeline_mode<synchronous>, transform_indices = @transform_2, window_bounds = array<i64: 1, 128>}, {transform_indices = @transform_3, window_bounds = array<i64: 512, 128>}]} {
    %c0 = arith.constant 0 : index
    %c0_0 = arith.constant 0 : index
    %0 = vector.load %arg1[%c0, %c0_0] : memref<512x128xf32, #tpu.memory_space<vmem>>, vector<512x128xf32>
    %c0_1 = arith.constant 0 : index
    %c0_2 = arith.constant 0 : index
    %1 = vector.load %arg2[%c0_1, %c0_2] : memref<1x128xf32, #tpu.memory_space<vmem>>, vector<1x128xf32>
    %2 = vector.broadcast %1 : vector<1x128xf32> to vector<512x128xf32>
    %3 = arith.mulf %0, %2 : vector<512x128xf32>
    %c0_3 = arith.constant 0 : index
    %c0_4 = arith.constant 0 : index
    %4 = vector.load %arg3[%c0_3, %c0_4] : memref<1x128xf32, #tpu.memory_space<vmem>>, vector<1x128xf32>
    %5 = vector.broadcast %4 : vector<1x128xf32> to vector<512x128xf32>
    %6 = arith.addf %3, %5 : vector<512x128xf32>
    %cst = arith.constant 0.000000e+00 : f32
    %7 = vector.broadcast %cst : f32 to vector<512x128xf32>
    %8 = arith.cmpf ogt, %6, %7 : vector<512x128xf32>
    %cst_5 = arith.constant 2.000000e-01 : f32
    %9 = vector.broadcast %cst_5 : f32 to vector<512x128xf32>
    %10 = arith.mulf %9, %6 : vector<512x128xf32>
    %11 = arith.select %8, %6, %10 : vector<512x128xi1>, vector<512x128xf32>
    %c0_6 = arith.constant 0 : index
    %c0_7 = arith.constant 0 : index
    %12 = vector.load %arg4[%c0_6, %c0_7] : memref<512x128xf32, #tpu.memory_space<vmem>>, vector<512x128xf32>
    tpu.vector_store %arg4[%c0_6, %c0_7], %11 {strides = array<i32>} : memref<512x128xf32, #tpu.memory_space<vmem>>, vector<512x128xf32>,
    return
  }
  func.func @transform_0(%arg0: i32) -> (i32, i32) {
    %c0_i32 = arith.constant 0 : i32
    %c0_i32_0 = arith.constant 0 : i32
    return %arg0, %c0_i32 : i32, i32
  }
  func.func @transform_1(%arg0: i32) -> (i32, i32) {
    %c0_i32 = arith.constant 0 : i32
    %c0_i32_0 = arith.constant 0 : i32
    %c0_i32_1 = arith.constant 0 : i32
    return %c0_i32, %c0_i32_0 : i32, i32
  }
  func.func @transform_2(%arg0: i32) -> (i32, i32) {
    %c0_i32 = arith.constant 0 : i32
    %c0_i32_0 = arith.constant 0 : i32
    %c0_i32_1 = arith.constant 0 : i32
    return %c0_i32, %c0_i32_0 : i32, i32
  }
  func.func @transform_3(%arg0: i32) -> (i32, i32) {
    %c0_i32 = arith.constant 0 : i32
    %c0_i32_0 = arith.constant 0 : i32
    return %arg0, %c0_i32 : i32, i32
  }
}

</mosaic_0001>

<bundles_post_ra>
// kernel: single_conv.3
= control target key start
LH: loop header
LB: loop body
LE: loop exit
PB: predicated region body
PF: predicated region fallthrough
CT: control target
= control target key end

     0   :  { %s1030_s0 = inlined_call_operand.vmem [shape: f32[512,128], index: 0, kind: input, shape index: {}]   ;;  %s1031_s1 = inlined_call_operand.vmem [shape: f32[1,128], index: 1, kind: input, shape index: {}]   ;;  %s1032_s2 = inlined_call_operand.vmem [shape: f32[1,128], index: 2, kind: input, shape index: {}]   ;;  %s1033_s3 = inlined_call_operand.vmem [shape: f32[512,128], index: 3, kind: output, shape index: {}]  }
   0x1   :  { %v14_v0 = vld [vmem:[%s1030_s0] sm:$0xff]  ;;  %v15_v4 = vld [vmem:[%s1030_s0 + $0x8] sm:$0xff]  ;;  %v16_v5 = vld [vmem:[%s1030_s0 + $0x10] sm:$0xff] }
   0x2   :  { %v508_v1 = vld [vmem:[%s1031_s1] ss:$0 sm:$0xff]  ;;  %v17_v6 = vld [vmem:[%s1030_s0 + $0x18] sm:$0xff]  ;;  %v19_v11 = vld [vmem:[%s1030_s0 + $0x28] sm:$0xff] }
   0x3   :  { %v513_v2 = vld [vmem:[%s1032_s2] ss:$0 sm:$0xff]  ;;  %v85_v3 = vmul.f32 %v508_v1, %v14_v0  ;;  %v86_v7 = vmul.f32 %v508_v1, %v15_v4  ;;  %v87_v8 = vmul.f32 %v508_v1, %v16_v5  ;;  %v88_v9 = vmul.f32 %v508_v1, %v17_v6  ;;  %v20_v12 = vld [vmem:[%s1030_s0 + $0x30] sm:$0xff]  ;;  %v21_v17 = vld [vmem:[%s1030_s0 + $0x38] sm:$0xff] }
   0x4   :  { %v18_v10 = vld [vmem:[%s1030_s0 + $0x20] sm:$0xff]  ;;  %v90_v15 = vmul.f32 %v508_v1, %v19_v11  ;;  %v91_v16 = vmul.f32 %v508_v1, %v20_v12  ;;  %v92_v21 = vmul.f32 %v508_v1, %v21_v17  ;;  %v23_v30 = vld [vmem:[%s1030_s0 + $0x48] sm:$0xff]  ;;  %v24_v31 = vld [vmem:[%s1030_s0 + $0x50] sm:$0xff] }
   0x5   :  { %v156_v13 = vadd.f32 %v513_v2, %v85_v3  ;;  %v89_v14 = vmul.f32 %v508_v1, %v18_v10  ;;  %v157_v18 = vadd.f32 %v513_v2, %v86_v7  ;;  %v158_v19 = vadd.f32 %v513_v2, %v87_v8  ;;  %v22_v25 = vld [vmem:[%s1030_s0 + $0x40] sm:$0xff]  ;;  %v25_v43 = vld [vmem:[%s1030_s0 + $0x58] sm:$0xff]  ;;  %v27_v45 = vld [vmem:[%s1030_s0 + $0x68] sm:$0xff] }
   0x6   :  { %v159_v20 = vadd.f32 %v513_v2, %v88_v9  ;;  %v161_v24 = vadd.f32 %v513_v2, %v90_v15  ;;  %v162_v37 = vadd.f32 %v513_v2, %v91_v16  ;;  %v163_v38 = vadd.f32 %v513_v2, %v92_v21  ;;  %v26_v44 = vld [vmem:[%s1030_s0 + $0x60] sm:$0xff]  ;;  %v28_v56 = vld [vmem:[%s1030_s0 + $0x70] sm:$0xff]  ;;  %v29_v4 = vld [vmem:[%s1030_s0 + $0x78] sm:$0xff] }
   0x7   :  { %vm220_vm0 = vcmp.gt.f32.partialorder %v156_v13, 0.0  ;;  %v284_v22 = vmul.f32 0.2, %v156_v13  ;;  %v160_v23 = vadd.f32 %v513_v2, %v89_v14  ;;  %vm221_vm1 = vcmp.gt.f32.partialorder %v157_v18, 0.0  ;;  %v30_v5 = vld [vmem:[%s1030_s0 + $0x80] sm:$0xff]  ;;  %v31_v9 = vld [vmem:[%s1030_s0 + $0x88] sm:$0xff] }
   0x8   :  { %v285_v26 = vmul.f32 0.2, %v157_v18  ;;  %vm222_vm2 = vcmp.gt.f32.partialorder %v158_v19, 0.0  ;;  %v286_v27 = vmul.f32 0.2, %v158_v19  ;;  %vm223_vm3 = vcmp.gt.f32.partialorder %v159_v20, 0.0 }
   0x9   :  { %v348_v28 = vsel %vm220_vm0, %v156_v13, %v284_v22  ;;  %v287_v29 = vmul.f32 0.2, %v159_v20  ;;  %vm224_vm4 = vcmp.gt.f32.partialorder %v160_v23, 0.0  ;;  %v288_v34 = vmul.f32 0.2, %v160_v23  ;;  %v32_v10 = vld [vmem:[%s1030_s0 + $0x90] sm:$0xff] }
   0xa   :  { %412 = vst [vmem:[%s1033_s3] sm:$0xff] %v348_v28  ;;  %v349_v32 = vsel %vm221_vm1, %v157_v18, %v285_v26  ;;  %v350_v33 = vsel %vm222_vm2, %v158_v19, %v286_v27  ;;  %vm225_vm5 = vcmp.gt.f32.partialorder %v161_v24, 0.0  ;;  %v289_v36 = vmul.f32 0.2, %v161_v24  ;;  %v33_v17 = vld [vmem:[%s1030_s0 + $0x98] sm:$0xff]  ;;  %v34_v18 = vld [vmem:[%s1030_s0 + $0xa0] sm:$0xff] }
   0xb   :  { %413 = vst [vmem:[%s1033_s3 + $0x8] sm:$0xff] %v349_v32  ;;  %414 = vst [vmem:[%s1033_s3 + $0x10] sm:$0xff] %v350_v33  ;;  %v351_v35 = vsel %vm223_vm3, %v159_v20, %v287_v29  ;;  %v352_v39 = vsel %vm224_vm4, %v160_v23, %v288_v34  ;;  %v93_v40 = vmul.f32 %v508_v1, %v22_v25  ;;  %vm226_vm6 = vcmp.gt.f32.partialorder %v162_v37, 0.0  ;;  %v35_v32 = vld [vmem:[%s1030_s0 + $0xa8] sm:$0xff]  ;;  %v36_v33 = vld [vmem:[%s1030_s0 + $0xb0] sm:$0xff] }
   0xc   :  { %415 = vst [vmem:[%s1033_s3 + $0x18] sm:$0xff] %v351_v35  ;;  %v94_v41 = vmul.f32 %v508_v1, %v23_v30  ;;  %v95_v42 = vmul.f32 %v508_v1, %v24_v31  ;;  %416 = vst [vmem:[%s1033_s3 + $0x20] sm:$0xff] %v352_v39  ;;  %v353_v46 = vsel %vm225_vm5, %v161_v24, %v289_v36  ;;  %v290_v47 = vmul.f32 0.2, %v162_v37 }
   0xd   :  { %vm227_vm7 = vcmp.gt.f32.partialorder %v163_v38, 0.0  ;;  %417 = vst [vmem:[%s1033_s3 + $0x28] sm:$0xff] %v353_v46  ;;  %v291_v48 = vmul.f32 0.2, %v163_v38  ;;  %v164_v49 = vadd.f32 %v513_v2, %v93_v40  ;;  %v96_v53 = vmul.f32 %v508_v1, %v25_v43  ;;  %v37_v40 = vld [vmem:[%s1030_s0 + $0xb8] sm:$0xff]  ;;  %v39_v46 = vld [vmem:[%s1030_s0 + $0xc8] sm:$0xff] }
   0xe   :  { %v165_v50 = vadd.f32 %v513_v2, %v94_v41  ;;  %v166_v51 = vadd.f32 %v513_v2, %v95_v42  ;;  %v354_v52 = vsel %vm226_vm6, %v162_v37, %v290_v47  ;;  %v97_v54 = vmul.f32 %v508_v1, %v26_v44  ;;  %v40_v47 = vld [vmem:[%s1030_s0 + $0xd0] sm:$0xff] }
   0xf   :  { %v98_v55 = vmul.f32 %v508_v1, %v27_v45  ;;  %418 = vst [vmem:[%s1033_s3 + $0x30] sm:$0xff] %v354_v52  ;;  %v355_v57 = vsel %vm227_vm7, %v163_v38, %v291_v48  ;;  %vm228_vm8 = vcmp.gt.f32.partialorder %v164_v49, 0.0  ;;  %v292_v58 = vmul.f32 0.2, %v164_v49  ;;  %v38_v45 = vld [vmem:[%s1030_s0 + $0xc0] sm:$0xff] }
  0x10   :  { %vm229_vm9 = vcmp.gt.f32.partialorder %v165_v50, 0.0  ;;  %419 = vst [vmem:[%s1033_s3 + $0x38] sm:$0xff] %v355_v57  ;;  %v293_v59 = vmul.f32 0.2, %v165_v50  ;;  %vm230_vm10 = vcmp.gt.f32.partialorder %v166_v51, 0.0  ;;  %v167_v61 = vadd.f32 %v513_v2, %v96_v53 }
  0x11   :  { %v294_v60 = vmul.f32 0.2, %v166_v51  ;;  %v356_v62 = vsel %vm228_vm8, %v164_v49, %v292_v58  ;;  %v168_v63 = vadd.f32 %v513_v2, %v97_v54  ;;  %v169_v0 = vadd.f32 %v513_v2, %v98_v55  ;;  %v41_v58 = vld [vmem:[%s1030_s0 + $0xd8] sm:$0xff] }
  0x12   :  { %v99_v3 = vmul.f32 %v508_v1, %v28_v56  ;;  %420 = vst [vmem:[%s1033_s3 + $0x40] sm:$0xff] %v356_v62  ;;  %v357_v6 = vsel %vm229_vm9, %v165_v50, %v293_v59  ;;  %vm231_vm11 = vcmp.gt.f32.partialorder %v167_v61, 0.0  ;;  %v295_v8 = vmul.f32 0.2, %v167_v61  ;;  %v42_v59 = vld [vmem:[%s1030_s0 + $0xe0] sm:$0xff] }
  0x13   :  { %v358_v7 = vsel %vm230_vm10, %v166_v51, %v294_v60  ;;  %421 = vst [vmem:[%s1033_s3 + $0x48] sm:$0xff] %v357_v6  ;;  %vm232_vm12 = vcmp.gt.f32.partialorder %v168_v63, 0.0  ;;  %v296_v11 = vmul.f32 0.2, %v168_v63  ;;  %vm233_vm13 = vcmp.gt.f32.partialorder %v169_v0, 0.0 }
  0x14   :  { %422 = vst [vmem:[%s1033_s3 + $0x50] sm:$0xff] %v358_v7  ;;  %v297_v12 = vmul.f32 0.2, %v169_v0  ;;  %v359_v13 = vsel %vm231_vm11, %v167_v61, %v295_v8  ;;  %v170_v14 = vadd.f32 %v513_v2, %v99_v3  ;;  %v100_v15 = vmul.f32 %v508_v1, %v29_v4 }
  0x15   :  { %v101_v16 = vmul.f32 %v508_v1, %v30_v5  ;;  %423 = vst [vmem:[%s1033_s3 + $0x58] sm:$0xff] %v359_v13  ;;  %v360_v19 = vsel %vm232_vm12, %v168_v63, %v296_v11  ;;  %v102_v21 = vmul.f32 %v508_v1, %v31_v9  ;;  %v103_v22 = vmul.f32 %v508_v1, %v32_v10  ;;  %v43_v10 = vld [vmem:[%s1030_s0 + $0xe8] sm:$0xff]  ;;  %v44_v11 = vld [vmem:[%s1030_s0 + $0xf0] sm:$0xff] }
  0x16   :  { %v361_v20 = vsel %vm233_vm13, %v169_v0, %v297_v12  ;;  %424 = vst [vmem:[%s1033_s3 + $0x60] sm:$0xff] %v360_v19  ;;  %vm234_vm14 = vcmp.gt.f32.partialorder %v170_v14, 0.0  ;;  %v298_v23 = vmul.f32 0.2, %v170_v14  ;;  %v171_v24 = vadd.f32 %v513_v2, %v100_v15 }
  0x17   :  { %425 = vst [vmem:[%s1033_s3 + $0x68] sm:$0xff] %v361_v20  ;;  %v172_v25 = vadd.f32 %v513_v2, %v101_v16  ;;  %v173_v26 = vadd.f32 %v513_v2, %v102_v21  ;;  %v174_v27 = vadd.f32 %v513_v2, %v103_v22  ;;  %v104_v28 = vmul.f32 %v508_v1, %v33_v17 }
  0x18   :  { %v105_v29 = vmul.f32 %v508_v1, %v34_v18  ;;  %v362_v30 = vsel %vm234_vm14, %v170_v14, %v298_v23  ;;  %vm235_vm15 = vcmp.gt.f32.partialorder %v171_v24, 0.0  ;;  %v299_v31 = vmul.f32 0.2, %v171_v24  ;;  %v45_v18 = vld [vmem:[%s1030_s0 + $0xf8] sm:$0xff]  ;;  %v46_v23 = vld [vmem:[%s1030_s0 + $0x100] sm:$0xff] }
  0x19   :  { %vm236_vm0 = vcmp.gt.f32.partialorder %v172_v25, 0.0  ;;  %426 = vst [vmem:[%s1033_s3 + $0x70] sm:$0xff] %v362_v30  ;;  %v300_v34 = vmul.f32 0.2, %v172_v25  ;;  %vm237_vm1 = vcmp.gt.f32.partialorder %v173_v26, 0.0  ;;  %vm238_vm2 = vcmp.gt.f32.partialorder %v174_v27, 0.0 }
  0x1a   :  { %v301_v35 = vmul.f32 0.2, %v173_v26  ;;  %v363_v36 = vsel %vm235_vm15, %v171_v24, %v299_v31  ;;  %v302_v37 = vmul.f32 0.2, %v174_v27  ;;  %v175_v38 = vadd.f32 %v513_v2, %v104_v28  ;;  %v47_v24 = vld [vmem:[%s1030_s0 + $0x108] sm:$0xff] }
  0x1b   :  { %v176_v39 = vadd.f32 %v513_v2, %v105_v29  ;;  %427 = vst [vmem:[%s1033_s3 + $0x78] sm:$0xff] %v363_v36  ;;  %v364_v41 = vsel %vm236_vm0, %v172_v25, %v300_v34  ;;  %v106_v43 = vmul.f32 %v508_v1, %v35_v32  ;;  %v107_v44 = vmul.f32 %v508_v1, %v36_v33  ;;  %v48_v25 = vld [vmem:[%s1030_s0 + $0x110] sm:$0xff]  ;;  %v49_v36 = vld [vmem:[%s1030_s0 + $0x118] sm:$0xff] }
  0x1c   :  { %v365_v42 = vsel %vm237_vm1, %v173_v26, %v301_v35  ;;  %428 = vst [vmem:[%s1033_s3 + $0x80] sm:$0xff] %v364_v41  ;;  %v366_v48 = vsel %vm238_vm2, %v174_v27, %v302_v37  ;;  %vm239_vm3 = vcmp.gt.f32.partialorder %v175_v38, 0.0  ;;  %v303_v49 = vmul.f32 0.2, %v175_v38  ;;  %v50_v37 = vld [vmem:[%s1030_s0 + $0x120] sm:$0xff] }
  0x1d   :  { %429 = vst [vmem:[%s1033_s3 + $0x88] sm:$0xff] %v365_v42  ;;  %vm240_vm4 = vcmp.gt.f32.partialorder %v176_v39, 0.0  ;;  %430 = vst [vmem:[%s1033_s3 + $0x90] sm:$0xff] %v366_v48  ;;  %v304_v50 = vmul.f32 0.2, %v176_v39  ;;  %v177_v51 = vadd.f32 %v513_v2, %v106_v43  ;;  %v178_v52 = vadd.f32 %v513_v2, %v107_v44 }
  0x1e   :  { %v108_v53 = vmul.f32 %v508_v1, %v37_v40  ;;  %v367_v54 = vsel %vm239_vm3, %v175_v38, %v303_v49  ;;  %v109_v55 = vmul.f32 %v508_v1, %v38_v45  ;;  %v110_v56 = vmul.f32 %v508_v1, %v39_v46 }
  0x1f   :  { %v111_v57 = vmul.f32 %v508_v1, %v40_v47  ;;  %431 = vst [vmem:[%s1033_s3 + $0x98] sm:$0xff] %v367_v54  ;;  %v368_v60 = vsel %vm240_vm4, %v176_v39, %v304_v50  ;;  %vm241_vm5 = vcmp.gt.f32.partialorder %v177_v51, 0.0  ;;  %v305_v61 = vmul.f32 0.2, %v177_v51  ;;  %v51_v50 = vld [vmem:[%s1030_s0 + $0x128] sm:$0xff] }
  0x20   :  { %vm242_vm6 = vcmp.gt.f32.partialorder %v178_v52, 0.0  ;;  %432 = vst [vmem:[%s1033_s3 + $0xa0] sm:$0xff] %v368_v60  ;;  %v306_v62 = vmul.f32 0.2, %v178_v52  ;;  %v179_v63 = vadd.f32 %v513_v2, %v108_v53  ;;  %v180_v0 = vadd.f32 %v513_v2, %v109_v55 }
  0x21   :  { %v181_v3 = vadd.f32 %v513_v2, %v110_v56  ;;  %v369_v4 = vsel %vm241_vm5, %v177_v51, %v305_v61  ;;  %v182_v5 = vadd.f32 %v513_v2, %v111_v57  ;;  %v112_v6 = vmul.f32 %v508_v1, %v41_v58  ;;  %v52_v51 = vld [vmem:[%s1030_s0 + $0x130] sm:$0xff]  ;;  %v53_v58 = vld [vmem:[%s1030_s0 + $0x138] sm:$0xff] }
  0x22   :  { %v113_v7 = vmul.f32 %v508_v1, %v42_v59  ;;  %433 = vst [vmem:[%s1033_s3 + $0xa8] sm:$0xff] %v369_v4  ;;  %v370_v8 = vsel %vm242_vm6, %v178_v52, %v306_v62  ;;  %vm243_vm7 = vcmp.gt.f32.partialorder %v179_v63, 0.0  ;;  %v307_v9 = vmul.f32 0.2, %v179_v63 }
  0x23   :  { %vm244_vm8 = vcmp.gt.f32.partialorder %v180_v0, 0.0  ;;  %434 = vst [vmem:[%s1033_s3 + $0xb0] sm:$0xff] %v370_v8  ;;  %v308_v12 = vmul.f32 0.2, %v180_v0  ;;  %vm245_vm9 = vcmp.gt.f32.partialorder %v181_v3, 0.0  ;;  %vm246_vm10 = vcmp.gt.f32.partialorder %v182_v5, 0.0 }
  0x24   :  { %v309_v13 = vmul.f32 0.2, %v181_v3  ;;  %v371_v14 = vsel %vm243_vm7, %v179_v63, %v307_v9  ;;  %v310_v15 = vmul.f32 0.2, %v182_v5  ;;  %v183_v16 = vadd.f32 %v513_v2, %v112_v6  ;;  %v54_v63 = vld [vmem:[%s1030_s0 + $0x140] sm:$0xff] }
  0x25   :  { %v184_v17 = vadd.f32 %v513_v2, %v113_v7  ;;  %435 = vst [vmem:[%s1033_s3 + $0xb8] sm:$0xff] %v371_v14  ;;  %v372_v19 = vsel %vm244_vm8, %v180_v0, %v308_v12  ;;  %v114_v21 = vmul.f32 %v508_v1, %v43_v10  ;;  %v115_v22 = vmul.f32 %v508_v1, %v44_v11  ;;  %v55_v0 = vld [vmem:[%s1030_s0 + $0x148] sm:$0xff]  ;;  %v57_v14 = vld [vmem:[%s1030_s0 + $0x158] sm:$0xff] }
  0x26   :  { %v373_v20 = vsel %vm245_vm9, %v181_v3, %v309_v13  ;;  %436 = vst [vmem:[%s1033_s3 + $0xc0] sm:$0xff] %v372_v19  ;;  %v374_v26 = vsel %vm246_vm10, %v182_v5, %v310_v15  ;;  %vm247_vm11 = vcmp.gt.f32.partialorder %v183_v16, 0.0  ;;  %v311_v27 = vmul.f32 0.2, %v183_v16  ;;  %v56_v3 = vld [vmem:[%s1030_s0 + $0x150] sm:$0xff]  ;;  %v58_v15 = vld [vmem:[%s1030_s0 + $0x160] sm:$0xff] }
  0x27   :  { %437 = vst [vmem:[%s1033_s3 + $0xc8] sm:$0xff] %v373_v20  ;;  %vm248_vm12 = vcmp.gt.f32.partialorder %v184_v17, 0.0  ;;  %438 = vst [vmem:[%s1033_s3 + $0xd0] sm:$0xff] %v374_v26  ;;  %v312_v28 = vmul.f32 0.2, %v184_v17  ;;  %v185_v29 = vadd.f32 %v513_v2, %v114_v21  ;;  %v186_v30 = vadd.f32 %v513_v2, %v115_v22 }
  0x28   :  { %v116_v31 = vmul.f32 %v508_v1, %v45_v18  ;;  %v375_v32 = vsel %vm247_vm11, %v183_v16, %v311_v27  ;;  %v117_v33 = vmul.f32 %v508_v1, %v46_v23  ;;  %v118_v34 = vmul.f32 %v508_v1, %v47_v24 }
  0x29   :  { %v119_v35 = vmul.f32 %v508_v1, %v48_v25  ;;  %439 = vst [vmem:[%s1033_s3 + $0xd8] sm:$0xff] %v375_v32  ;;  %v376_v38 = vsel %vm248_vm12, %v184_v17, %v312_v28  ;;  %vm249_vm13 = vcmp.gt.f32.partialorder %v185_v29, 0.0  ;;  %v313_v39 = vmul.f32 0.2, %v185_v29  ;;  %v59_v28 = vld [vmem:[%s1030_s0 + $0x168] sm:$0xff] }
  0x2a   :  { %vm250_vm14 = vcmp.gt.f32.partialorder %v186_v30, 0.0  ;;  %440 = vst [vmem:[%s1033_s3 + $0xe0] sm:$0xff] %v376_v38  ;;  %v314_v40 = vmul.f32 0.2, %v186_v30  ;;  %v187_v41 = vadd.f32 %v513_v2, %v116_v31  ;;  %v188_v42 = vadd.f32 %v513_v2, %v117_v33 }
  0x2b   :  { %v189_v43 = vadd.f32 %v513_v2, %v118_v34  ;;  %v377_v44 = vsel %vm249_vm13, %v185_v29, %v313_v39  ;;  %v190_v45 = vadd.f32 %v513_v2, %v119_v35  ;;  %v120_v46 = vmul.f32 %v508_v1, %v49_v36  ;;  %v60_v29 = vld [vmem:[%s1030_s0 + $0x170] sm:$0xff]  ;;  %v61_v36 = vld [vmem:[%s1030_s0 + $0x178] sm:$0xff] }
  0x2c   :  { %v121_v47 = vmul.f32 %v508_v1, %v50_v37  ;;  %441 = vst [vmem:[%s1033_s3 + $0xe8] sm:$0xff] %v377_v44  ;;  %v378_v48 = vsel %vm250_vm14, %v186_v30, %v314_v40  ;;  %vm251_vm15 = vcmp.gt.f32.partialorder %v187_v41, 0.0  ;;  %v315_v49 = vmul.f32 0.2, %v187_v41 }
  0x2d   :  { %vm252_vm0 = vcmp.gt.f32.partialorder %v188_v42, 0.0  ;;  %442 = vst [vmem:[%s1033_s3 + $0xf0] sm:$0xff] %v378_v48  ;;  %v316_v52 = vmul.f32 0.2, %v188_v42  ;;  %vm253_vm1 = vcmp.gt.f32.partialorder %v189_v43, 0.0  ;;  %vm254_vm2 = vcmp.gt.f32.partialorder %v190_v45, 0.0 }
  0x2e   :  { %v317_v53 = vmul.f32 0.2, %v189_v43  ;;  %v379_v54 = vsel %vm251_vm15, %v187_v41, %v315_v49  ;;  %v318_v55 = vmul.f32 0.2, %v190_v45  ;;  %v191_v56 = vadd.f32 %v513_v2, %v120_v46  ;;  %v62_v41 = vld [vmem:[%s1030_s0 + $0x180] sm:$0xff] }
  0x2f   :  { %v192_v57 = vadd.f32 %v513_v2, %v121_v47  ;;  %443 = vst [vmem:[%s1033_s3 + $0xf8] sm:$0xff] %v379_v54  ;;  %v380_v59 = vsel %vm252_vm0, %v188_v42, %v316_v52  ;;  %v122_v61 = vmul.f32 %v508_v1, %v51_v50  ;;  %v123_v62 = vmul.f32 %v508_v1, %v52_v51  ;;  %v63_v42 = vld [vmem:[%s1030_s0 + $0x188] sm:$0xff]  ;;  %v65_v54 = vld [vmem:[%s1030_s0 + $0x198] sm:$0xff] }
  0x30   :  { %v381_v60 = vsel %vm253_vm1, %v189_v43, %v317_v53  ;;  %444 = vst [vmem:[%s1033_s3 + $0x100] sm:$0xff] %v380_v59  ;;  %v382_v4 = vsel %vm254_vm2, %v190_v45, %v318_v55  ;;  %vm255_vm3 = vcmp.gt.f32.partialorder %v191_v56, 0.0  ;;  %v319_v5 = vmul.f32 0.2, %v191_v56  ;;  %v64_v43 = vld [vmem:[%s1030_s0 + $0x190] sm:$0xff]  ;;  %v66_v55 = vld [vmem:[%s1030_s0 + $0x1a0] sm:$0xff] }
  0x31   :  { %445 = vst [vmem:[%s1033_s3 + $0x108] sm:$0xff] %v381_v60  ;;  %vm256_vm4 = vcmp.gt.f32.partialorder %v192_v57, 0.0  ;;  %446 = vst [vmem:[%s1033_s3 + $0x110] sm:$0xff] %v382_v4  ;;  %v320_v6 = vmul.f32 0.2, %v192_v57  ;;  %v193_v7 = vadd.f32 %v513_v2, %v122_v61  ;;  %v194_v8 = vadd.f32 %v513_v2, %v123_v62 }
  0x32   :  { %v124_v9 = vmul.f32 %v508_v1, %v53_v58  ;;  %v383_v10 = vsel %vm255_vm3, %v191_v56, %v319_v5  ;;  %v125_v11 = vmul.f32 %v508_v1, %v54_v63  ;;  %v126_v12 = vmul.f32 %v508_v1, %v55_v0 }
  0x33   :  { %v127_v13 = vmul.f32 %v508_v1, %v56_v3  ;;  %447 = vst [vmem:[%s1033_s3 + $0x118] sm:$0xff] %v383_v10  ;;  %v384_v16 = vsel %vm256_vm4, %v192_v57, %v320_v6  ;;  %vm257_vm5 = vcmp.gt.f32.partialorder %v193_v7, 0.0  ;;  %v321_v17 = vmul.f32 0.2, %v193_v7  ;;  %v67_v6 = vld [vmem:[%s1030_s0 + $0x1a8] sm:$0xff] }
  0x34   :  { %vm258_vm6 = vcmp.gt.f32.partialorder %v194_v8, 0.0  ;;  %448 = vst [vmem:[%s1033_s3 + $0x120] sm:$0xff] %v384_v16  ;;  %v322_v18 = vmul.f32 0.2, %v194_v8  ;;  %v195_v19 = vadd.f32 %v513_v2, %v124_v9  ;;  %v196_v20 = vadd.f32 %v513_v2, %v125_v11 }
  0x35   :  { %v197_v21 = vadd.f32 %v513_v2, %v126_v12  ;;  %v385_v22 = vsel %vm257_vm5, %v193_v7, %v321_v17  ;;  %v198_v23 = vadd.f32 %v513_v2, %v127_v13  ;;  %v128_v24 = vmul.f32 %v508_v1, %v57_v14  ;;  %v68_v7 = vld [vmem:[%s1030_s0 + $0x1b0] sm:$0xff]  ;;  %v69_v14 = vld [vmem:[%s1030_s0 + $0x1b8] sm:$0xff] }
  0x36   :  { %v129_v25 = vmul.f32 %v508_v1, %v58_v15  ;;  %449 = vst [vmem:[%s1033_s3 + $0x128] sm:$0xff] %v385_v22  ;;  %v386_v26 = vsel %vm258_vm6, %v194_v8, %v322_v18  ;;  %vm259_vm7 = vcmp.gt.f32.partialorder %v195_v19, 0.0  ;;  %v323_v27 = vmul.f32 0.2, %v195_v19 }
  0x37   :  { %vm260_vm8 = vcmp.gt.f32.partialorder %v196_v20, 0.0  ;;  %450 = vst [vmem:[%s1033_s3 + $0x130] sm:$0xff] %v386_v26  ;;  %v324_v30 = vmul.f32 0.2, %v196_v20  ;;  %vm261_vm9 = vcmp.gt.f32.partialorder %v197_v21, 0.0  ;;  %vm262_vm10 = vcmp.gt.f32.partialorder %v198_v23, 0.0 }
  0x38   :  { %v325_v31 = vmul.f32 0.2, %v197_v21  ;;  %v387_v32 = vsel %vm259_vm7, %v195_v19, %v323_v27  ;;  %v326_v33 = vmul.f32 0.2, %v198_v23  ;;  %v199_v34 = vadd.f32 %v513_v2, %v128_v24  ;;  %v70_v19 = vld [vmem:[%s1030_s0 + $0x1c0] sm:$0xff] }
  0x39   :  { %v200_v35 = vadd.f32 %v513_v2, %v129_v25  ;;  %451 = vst [vmem:[%s1033_s3 + $0x138] sm:$0xff] %v387_v32  ;;  %v388_v37 = vsel %vm260_vm8, %v196_v20, %v324_v30  ;;  %v130_v39 = vmul.f32 %v508_v1, %v59_v28  ;;  %v131_v40 = vmul.f32 %v508_v1, %v60_v29  ;;  %v71_v20 = vld [vmem:[%s1030_s0 + $0x1c8] sm:$0xff]  ;;  %v73_v32 = vld [vmem:[%s1030_s0 + $0x1d8] sm:$0xff] }
  0x3a   :  { %v389_v38 = vsel %vm261_vm9, %v197_v21, %v325_v31  ;;  %452 = vst [vmem:[%s1033_s3 + $0x140] sm:$0xff] %v388_v37  ;;  %v390_v44 = vsel %vm262_vm10, %v198_v23, %v326_v33  ;;  %vm263_vm11 = vcmp.gt.f32.partialorder %v199_v34, 0.0  ;;  %v327_v45 = vmul.f32 0.2, %v199_v34  ;;  %v72_v21 = vld [vmem:[%s1030_s0 + $0x1d0] sm:$0xff]  ;;  %v74_v33 = vld [vmem:[%s1030_s0 + $0x1e0] sm:$0xff] }
  0x3b   :  { %453 = vst [vmem:[%s1033_s3 + $0x148] sm:$0xff] %v389_v38  ;;  %vm264_vm12 = vcmp.gt.f32.partialorder %v200_v35, 0.0  ;;  %454 = vst [vmem:[%s1033_s3 + $0x150] sm:$0xff] %v390_v44  ;;  %v328_v46 = vmul.f32 0.2, %v200_v35  ;;  %v201_v47 = vadd.f32 %v513_v2, %v130_v39  ;;  %v202_v48 = vadd.f32 %v513_v2, %v131_v40 }
  0x3c   :  { %v132_v49 = vmul.f32 %v508_v1, %v61_v36  ;;  %v391_v50 = vsel %vm263_vm11, %v199_v34, %v327_v45  ;;  %v133_v51 = vmul.f32 %v508_v1, %v62_v41  ;;  %v134_v52 = vmul.f32 %v508_v1, %v63_v42 }
  0x3d   :  { %v135_v53 = vmul.f32 %v508_v1, %v64_v43  ;;  %455 = vst [vmem:[%s1033_s3 + $0x158] sm:$0xff] %v391_v50  ;;  %v392_v56 = vsel %vm264_vm12, %v200_v35, %v328_v46  ;;  %vm265_vm13 = vcmp.gt.f32.partialorder %v201_v47, 0.0  ;;  %v329_v57 = vmul.f32 0.2, %v201_v47  ;;  %v75_v46 = vld [vmem:[%s1030_s0 + $0x1e8] sm:$0xff] }
  0x3e   :  { %vm266_vm14 = vcmp.gt.f32.partialorder %v202_v48, 0.0  ;;  %456 = vst [vmem:[%s1033_s3 + $0x160] sm:$0xff] %v392_v56  ;;  %v330_v58 = vmul.f32 0.2, %v202_v48  ;;  %v203_v59 = vadd.f32 %v513_v2, %v132_v49  ;;  %v204_v60 = vadd.f32 %v513_v2, %v133_v51 }
  0x3f   :  { %v205_v61 = vadd.f32 %v513_v2, %v134_v52  ;;  %v393_v62 = vsel %vm265_vm13, %v201_v47, %v329_v57  ;;  %v206_v63 = vadd.f32 %v513_v2, %v135_v53  ;;  %v136_v0 = vmul.f32 %v508_v1, %v65_v54  ;;  %v76_v47 = vld [vmem:[%s1030_s0 + $0x1f0] sm:$0xff]  ;;  %v77_v54 = vld [vmem:[%s1030_s0 + $0x1f8] sm:$0xff] }
  0x40   :  { %v137_v3 = vmul.f32 %v508_v1, %v66_v55  ;;  %457 = vst [vmem:[%s1033_s3 + $0x168] sm:$0xff] %v393_v62  ;;  %v394_v4 = vsel %vm266_vm14, %v202_v48, %v330_v58  ;;  %vm267_vm15 = vcmp.gt.f32.partialorder %v203_v59, 0.0  ;;  %v331_v5 = vmul.f32 0.2, %v203_v59 }
  0x41   :  { %vm268_vm0 = vcmp.gt.f32.partialorder %v204_v60, 0.0  ;;  %458 = vst [vmem:[%s1033_s3 + $0x170] sm:$0xff] %v394_v4  ;;  %v332_v8 = vmul.f32 0.2, %v204_v60  ;;  %vm269_vm1 = vcmp.gt.f32.partialorder %v205_v61, 0.0  ;;  %vm270_vm2 = vcmp.gt.f32.partialorder %v206_v63, 0.0 }
  0x42   :  { %v333_v9 = vmul.f32 0.2, %v205_v61  ;;  %v395_v10 = vsel %vm267_vm15, %v203_v59, %v331_v5  ;;  %v334_v11 = vmul.f32 0.2, %v206_v63  ;;  %v207_v12 = vadd.f32 %v513_v2, %v136_v0 }
  0x43   :  { %v208_v13 = vadd.f32 %v513_v2, %v137_v3  ;;  %459 = vst [vmem:[%s1033_s3 + $0x178] sm:$0xff] %v395_v10  ;;  %v396_v15 = vsel %vm268_vm0, %v204_v60, %v332_v8  ;;  %v138_v17 = vmul.f32 %v508_v1, %v67_v6  ;;  %v139_v18 = vmul.f32 %v508_v1, %v68_v7 }
  0x44   :  { %v397_v16 = vsel %vm269_vm1, %v205_v61, %v333_v9  ;;  %460 = vst [vmem:[%s1033_s3 + $0x180] sm:$0xff] %v396_v15  ;;  %v398_v22 = vsel %vm270_vm2, %v206_v63, %v334_v11  ;;  %vm271_vm3 = vcmp.gt.f32.partialorder %v207_v12, 0.0  ;;  %v335_v23 = vmul.f32 0.2, %v207_v12 }
  0x45   :  { %461 = vst [vmem:[%s1033_s3 + $0x188] sm:$0xff] %v397_v16  ;;  %vm272_vm4 = vcmp.gt.f32.partialorder %v208_v13, 0.0  ;;  %462 = vst [vmem:[%s1033_s3 + $0x190] sm:$0xff] %v398_v22  ;;  %v336_v24 = vmul.f32 0.2, %v208_v13  ;;  %v209_v25 = vadd.f32 %v513_v2, %v138_v17  ;;  %v210_v26 = vadd.f32 %v513_v2, %v139_v18 }
  0x46   :  { %v140_v27 = vmul.f32 %v508_v1, %v69_v14  ;;  %v399_v28 = vsel %vm271_vm3, %v207_v12, %v335_v23  ;;  %v141_v29 = vmul.f32 %v508_v1, %v70_v19  ;;  %v142_v30 = vmul.f32 %v508_v1, %v71_v20 }
  0x47   :  { %v143_v31 = vmul.f32 %v508_v1, %v72_v21  ;;  %463 = vst [vmem:[%s1033_s3 + $0x198] sm:$0xff] %v399_v28  ;;  %v400_v34 = vsel %vm272_vm4, %v208_v13, %v336_v24  ;;  %vm273_vm5 = vcmp.gt.f32.partialorder %v209_v25, 0.0  ;;  %v337_v35 = vmul.f32 0.2, %v209_v25 }
  0x48   :  { %vm274_vm6 = vcmp.gt.f32.partialorder %v210_v26, 0.0  ;;  %464 = vst [vmem:[%s1033_s3 + $0x1a0] sm:$0xff] %v400_v34  ;;  %v338_v36 = vmul.f32 0.2, %v210_v26  ;;  %v211_v37 = vadd.f32 %v513_v2, %v140_v27  ;;  %v212_v38 = vadd.f32 %v513_v2, %v141_v29 }
  0x49   :  { %v213_v39 = vadd.f32 %v513_v2, %v142_v30  ;;  %v401_v40 = vsel %vm273_vm5, %v209_v25, %v337_v35  ;;  %v214_v41 = vadd.f32 %v513_v2, %v143_v31  ;;  %v144_v42 = vmul.f32 %v508_v1, %v73_v32 }
  0x4a   :  { %v145_v43 = vmul.f32 %v508_v1, %v74_v33  ;;  %465 = vst [vmem:[%s1033_s3 + $0x1a8] sm:$0xff] %v401_v40  ;;  %v402_v44 = vsel %vm274_vm6, %v210_v26, %v338_v36  ;;  %vm275_vm7 = vcmp.gt.f32.partialorder %v211_v37, 0.0  ;;  %v339_v45 = vmul.f32 0.2, %v211_v37 }
  0x4b   :  { %vm276_vm8 = vcmp.gt.f32.partialorder %v212_v38, 0.0  ;;  %466 = vst [vmem:[%s1033_s3 + $0x1b0] sm:$0xff] %v402_v44  ;;  %v340_v48 = vmul.f32 0.2, %v212_v38  ;;  %vm277_vm9 = vcmp.gt.f32.partialorder %v213_v39, 0.0  ;;  %vm278_vm10 = vcmp.gt.f32.partialorder %v214_v41, 0.0 }
  0x4c   :  { %v341_v49 = vmul.f32 0.2, %v213_v39  ;;  %v403_v50 = vsel %vm275_vm7, %v211_v37, %v339_v45  ;;  %v342_v51 = vmul.f32 0.2, %v214_v41  ;;  %v215_v52 = vadd.f32 %v513_v2, %v144_v42 }
  0x4d   :  { %v216_v53 = vadd.f32 %v513_v2, %v145_v43  ;;  %467 = vst [vmem:[%s1033_s3 + $0x1b8] sm:$0xff] %v403_v50  ;;  %v404_v55 = vsel %vm276_vm8, %v212_v38, %v340_v48  ;;  %v146_v57 = vmul.f32 %v508_v1, %v75_v46  ;;  %v147_v58 = vmul.f32 %v508_v1, %v76_v47 }
  0x4e   :  { %v405_v56 = vsel %vm277_vm9, %v213_v39, %v341_v49  ;;  %468 = vst [vmem:[%s1033_s3 + $0x1c0] sm:$0xff] %v404_v55  ;;  %v406_v59 = vsel %vm278_vm10, %v214_v41, %v342_v51  ;;  %vm279_vm11 = vcmp.gt.f32.partialorder %v215_v52, 0.0  ;;  %v343_v60 = vmul.f32 0.2, %v215_v52 }
  0x4f   :  { %469 = vst [vmem:[%s1033_s3 + $0x1c8] sm:$0xff] %v405_v56  ;;  %vm280_vm12 = vcmp.gt.f32.partialorder %v216_v53, 0.0  ;;  %470 = vst [vmem:[%s1033_s3 + $0x1d0] sm:$0xff] %v406_v59  ;;  %v344_v61 = vmul.f32 0.2, %v216_v53  ;;  %v217_v62 = vadd.f32 %v513_v2, %v146_v57  ;;  %v218_v63 = vadd.f32 %v513_v2, %v147_v58 }
  0x50   :  { %v148_v0 = vmul.f32 %v508_v1, %v77_v54  ;;  %v407_v3 = vsel %vm279_vm11, %v215_v52, %v343_v60 }
  0x51   :  { %471 = vst [vmem:[%s1033_s3 + $0x1d8] sm:$0xff] %v407_v3  ;;  %v408_v4 = vsel %vm280_vm12, %v216_v53, %v344_v61  ;;  %vm281_vm13 = vcmp.gt.f32.partialorder %v217_v62, 0.0  ;;  %v345_v5 = vmul.f32 0.2, %v217_v62  ;;  %vm282_vm14 = vcmp.gt.f32.partialorder %v218_v63, 0.0 }
  0x52   :  { %472 = vst [vmem:[%s1033_s3 + $0x1e0] sm:$0xff] %v408_v4  ;;  %v346_v6 = vmul.f32 0.2, %v218_v63  ;;  %v219_v7 = vadd.f32 %v513_v2, %v148_v0 }
  0x53   :  { %v409_v8 = vsel %vm281_vm13, %v217_v62, %v345_v5 }
  0x54   :  { %473 = vst [vmem:[%s1033_s3 + $0x1e8] sm:$0xff] %v409_v8  ;;  %v410_v1 = vsel %vm282_vm14, %v218_v63, %v346_v6  ;;  %vm283_vm15 = vcmp.gt.f32.partialorder %v219_v7, 0.0  ;;  %v347_v9 = vmul.f32 0.2, %v219_v7 }
  0x55   :  { %474 = vst [vmem:[%s1033_s3 + $0x1f0] sm:$0xff] %v410_v1 }
  0x56   :  { %v411_v10 = vsel %vm283_vm15, %v219_v7, %v347_v9 }
  0x57   :  { %475 = vst [vmem:[%s1033_s3 + $0x1f8] sm:$0xff] %v411_v10 }

// kernel: single_conv.2
= control target key start
LH: loop header
LB: loop body
LE: loop exit
PB: predicated region body
PF: predicated region fallthrough
CT: control target
= control target key end

     0   :  { %vm83_vm0 = vcmask 392192   ;;  %s1875_s1 = inlined_call_operand.vmem [shape: f32[48,128], index: 1, kind: input, shape index: {}]   ;;  %s1876_s0 = inlined_call_operand.vmem [shape: f32[512,48], index: 0, kind: input, shape index: {}]   ;;  %s1877_s2 = inlined_call_operand.vmem [shape: f32[512,128], index: 2, kind: output, shape index: {0}]   ;;  %s1878_s3 = inlined_call_operand.vmem [shape: f32[1,2,128], index: 3, kind: output, shape index: {1}]  }
   0x1   :  { %v82_v0 = vld [vmem:[%s1875_s1 + $0x28] sm:$0xff]  ;;  %v81_v1 = vld [vmem:[%s1875_s1 + $0x20] sm:$0xff]  ;;  %v80_v2 = vld [vmem:[%s1875_s1 + $0x18] sm:$0xff] }
   0x2   :  { %1071 = vmatprep.subr.mxu0 %v82_v0  ;;  %1179 = vmatprep.subr.mxu1 %v82_v0  ;;  %v13_v3 = vld [vmem:[%s1876_s0] sm:$0xff]  ;;  %v79_v4 = vld [vmem:[%s1875_s1 + $0x10] sm:$0xff]  ;;  %v78_v5 = vld [vmem:[%s1875_s1 + $0x8] sm:$0xff] }
   0x3   :  { %1072 = vmatpush3.msra.mxu0 %v82_v0  ;;  %1185 = vmatpush3.msra.mxu1 %v82_v0  ;;  %v77_v6 = vld [vmem:[%s1875_s1] sm:$0xff]  ;;  %v14_v7 = vld [vmem:[%s1876_s0 + $0x8] sm:$0xff]  ;;  %v15_v8 = vld [vmem:[%s1876_s0 + $0x10] sm:$0xff] }
   0x4   :  { %1073 = vmatprep.subr.mxu0 %v81_v1  ;;  %1083 = vmatprep.mubr.msk.f32.mxu0 %vm83_vm0, %v13_v3  ;;  %v45_v9 = vld [vmem:[%s1876_s0 + $0x100] sm:$0xff]  ;;  %v46_v10 = vld [vmem:[%s1876_s0 + $0x108] sm:$0xff]  ;;  %v47_v11 = vld [vmem:[%s1876_s0 + $0x110] sm:$0xff] }
   0x5   :  { %1074 = vmatpush3.msra.mxu0 %v81_v1  ;;  %1180 = vmatprep.subr.mxu1 %v81_v1  ;;  %v16_v12 = vld [vmem:[%s1876_s0 + $0x18] sm:$0xff]  ;;  %v17_v13 = vld [vmem:[%s1876_s0 + $0x20] sm:$0xff]  ;;  %v18_v16 = vld [vmem:[%s1876_s0 + $0x28] sm:$0xff] }
   0x6   :  { %1075 = vmatprep.subr.mxu0 %v80_v2  ;;  %1186 = vmatpush3.msra.mxu1 %v81_v1  ;;  %v48_v14 = vld [vmem:[%s1876_s0 + $0x118] sm:$0xff]  ;;  %v49_v15 = vld [vmem:[%s1876_s0 + $0x120] sm:$0xff]  ;;  %v19_v17 = vld [vmem:[%s1876_s0 + $0x30] sm:$0xff] }
   0x7   :  { %1076 = vmatpush3.msra.mxu0 %v80_v2  ;;  %1181 = vmatprep.subr.mxu1 %v80_v2  ;;  %v50_v18 = vld [vmem:[%s1876_s0 + $0x128] sm:$0xff]  ;;  %v51_v19 = vld [vmem:[%s1876_s0 + $0x130] sm:$0xff]  ;;  %v20_v20 = vld [vmem:[%s1876_s0 + $0x38] sm:$0xff] }
   0x8   :  { %1077 = vmatprep.subr.mxu0 %v79_v4  ;;  %1187 = vmatpush3.msra.mxu1 %v80_v2  ;;  %v21_v21 = vld [vmem:[%s1876_s0 + $0x40] sm:$0xff]  ;;  %v52_v22 = vld [vmem:[%s1876_s0 + $0x138] sm:$0xff]  ;;  %v22_v24 = vld [vmem:[%s1876_s0 + $0x48] sm:$0xff] }
   0x9   :  { %1078 = vmatpush3.msra.mxu0 %v79_v4  ;;  %1182 = vmatprep.subr.mxu1 %v79_v4  ;;  %v53_v23 = vld [vmem:[%s1876_s0 + $0x140] sm:$0xff]  ;;  %v23_v25 = vld [vmem:[%s1876_s0 + $0x50] sm:$0xff]  ;;  %v54_v26 = vld [vmem:[%s1876_s0 + $0x148] sm:$0xff] }
   0xa   :  { %1079 = vmatprep.subr.mxu0 %v78_v5  ;;  %1188 = vmatpush3.msra.mxu1 %v79_v4  ;;  %v55_v27 = vld [vmem:[%s1876_s0 + $0x150] sm:$0xff]  ;;  %v24_v28 = vld [vmem:[%s1876_s0 + $0x58] sm:$0xff]  ;;  %v25_v29 = vld [vmem:[%s1876_s0 + $0x60] sm:$0xff] }
   0xb   :  { %1080 = vmatpush3.msra.mxu0 %v78_v5  ;;  %1183 = vmatprep.subr.mxu1 %v78_v5  ;;  %v56_v30 = vld [vmem:[%s1876_s0 + $0x158] sm:$0xff]  ;;  %v57_v31 = vld [vmem:[%s1876_s0 + $0x160] sm:$0xff]  ;;  %v26_v32 = vld [vmem:[%s1876_s0 + $0x68] sm:$0xff] }
   0xc   :  { %1081 = vmatprep.subr.mxu0 %v77_v6  ;;  %1189 = vmatpush3.msra.mxu1 %v78_v5  ;;  %v27_v33 = vld [vmem:[%s1876_s0 + $0x70] sm:$0xff]  ;;  %v58_v34 = vld [vmem:[%s1876_s0 + $0x168] sm:$0xff]  ;;  %v28_v36 = vld [vmem:[%s1876_s0 + $0x78] sm:$0xff] }
   0xd   :  { %1082 = vmatpush3.msra.mxu0 %v77_v6  ;;  %1184 = vmatprep.subr.mxu1 %v77_v6  ;;  %v59_v35 = vld [vmem:[%s1876_s0 + $0x170] sm:$0xff]  ;;  %v29_v37 = vld [vmem:[%s1876_s0 + $0x80] sm:$0xff]  ;;  %v60_v38 = vld [vmem:[%s1876_s0 + $0x178] sm:$0xff] }
   0xe   :  { %1084 = vmatmul.mubr.msk.f32.vlgmr.msra.gmra.mxu0 %vm83_vm0, %v14_v7  ;;  %1190 = vmatpush3.msra.mxu1 %v77_v6  ;;  %v61_v39 = vld [vmem:[%s1876_s0 + $0x180] sm:$0xff]  ;;  %v30_v40 = vld [vmem:[%s1876_s0 + $0x88] sm:$0xff]  ;;  %v31_v41 = vld [vmem:[%s1876_s0 + $0x90] sm:$0xff] }
   0xf   :  { %1086 = vmatprep.mubr.msk.f32.mxu0 %vm83_vm0, %v15_v8  ;;  %1131 = vmatprep.mubr.msk.f32.mxu1 %vm83_vm0, %v45_v9  ;;  %v62_v42 = vld [vmem:[%s1876_s0 + $0x188] sm:$0xff]  ;;  %v63_v43 = vld [vmem:[%s1876_s0 + $0x190] sm:$0xff]  ;;  %v32_v44 = vld [vmem:[%s1876_s0 + $0x98] sm:$0xff] }
  0x10   :  { %1132 = vmatmul.mubr.msk.f32.vlgmr.msra.gmra.mxu1 %vm83_vm0, %v46_v10  ;;  %v33_v45 = vld [vmem:[%s1876_s0 + $0xa0] sm:$0xff]  ;;  %v64_v46 = vld [vmem:[%s1876_s0 + $0x198] sm:$0xff]  ;;  %v34_v48 = vld [vmem:[%s1876_s0 + $0xa8] sm:$0xff] }
  0x11   :  { %1134 = vmatprep.mubr.msk.f32.mxu1 %vm83_vm0, %v47_v11  ;;  %v65_v47 = vld [vmem:[%s1876_s0 + $0x1a0] sm:$0xff]  ;;  %v35_v49 = vld [vmem:[%s1876_s0 + $0xb0] sm:$0xff]  ;;  %v66_v50 = vld [vmem:[%s1876_s0 + $0x1a8] sm:$0xff] }
  0x12   :  { %1087 = vmatmul.mubr.msk.f32.gmra.mxu0 %vm83_vm0, %v16_v12  ;;  %v67_v51 = vld [vmem:[%s1876_s0 + $0x1b0] sm:$0xff]  ;;  %v36_v52 = vld [vmem:[%s1876_s0 + $0xb8] sm:$0xff]  ;;  %v37_v53 = vld [vmem:[%s1876_s0 + $0xc0] sm:$0xff] }
  0x13   :  { %1089 = vmatprep.mubr.msk.f32.mxu0 %vm83_vm0, %v17_v13  ;;  %v68_v54 = vld [vmem:[%s1876_s0 + $0x1b8] sm:$0xff]  ;;  %v69_v55 = vld [vmem:[%s1876_s0 + $0x1c0] sm:$0xff]  ;;  %v38_v56 = vld [vmem:[%s1876_s0 + $0xc8] sm:$0xff] }
  0x14   :  { %1135 = vmatmul.mubr.msk.f32.gmra.mxu1 %vm83_vm0, %v48_v14  ;;  %v39_v57 = vld [vmem:[%s1876_s0 + $0xd0] sm:$0xff]  ;;  %v70_v58 = vld [vmem:[%s1876_s0 + $0x1c8] sm:$0xff]  ;;  %v40_v60 = vld [vmem:[%s1876_s0 + $0xd8] sm:$0xff] }
  0x15   :  { %1137 = vmatprep.mubr.msk.f32.mxu1 %vm83_vm0, %v49_v15  ;;  %v71_v59 = vld [vmem:[%s1876_s0 + $0x1d0] sm:$0xff]  ;;  %v41_v61 = vld [vmem:[%s1876_s0 + $0xe0] sm:$0xff]  ;;  %v72_v62 = vld [vmem:[%s1876_s0 + $0x1d8] sm:$0xff] }
  0x16   :  { %1090 = vmatmul.mubr.msk.f32.gmra.mxu0 %vm83_vm0, %v18_v16  ;;  %v73_v63 = vld [vmem:[%s1876_s0 + $0x1e0] sm:$0xff]  ;;  %v42_v0 = vld [vmem:[%s1876_s0 + $0xe8] sm:$0xff]  ;;  %v43_v1 = vld [vmem:[%s1876_s0 + $0xf0] sm:$0xff] }
  0x17   :  { %1092 = vmatprep.mubr.msk.f32.mxu0 %vm83_vm0, %v19_v17  ;;  %v74_v2 = vld [vmem:[%s1876_s0 + $0x1e8] sm:$0xff]  ;;  %v75_v3 = vld [vmem:[%s1876_s0 + $0x1f0] sm:$0xff]  ;;  %v44_v4 = vld [vmem:[%s1876_s0 + $0xf8] sm:$0xff] }
  0x18   :  { %1138 = vmatmul.mubr.msk.f32.gmra.mxu1 %vm83_vm0, %v50_v18  ;;  %v76_v5 = vld [vmem:[%s1876_s0 + $0x1f8] sm:$0xff] }
  0x19   :  { %1140 = vmatprep.mubr.msk.f32.mxu1 %vm83_vm0, %v51_v19 }
  0x1a   :  { %1093 = vmatmul.mubr.msk.f32.gmra.mxu0 %vm83_vm0, %v20_v20 }
  0x1b   :  { %1095 = vmatprep.mubr.msk.f32.mxu0 %vm83_vm0, %v21_v21 }
  0x1c   :  { %1141 = vmatmul.mubr.msk.f32.gmra.mxu1 %vm83_vm0, %v52_v22 }
  0x1d   :  { %1143 = vmatprep.mubr.msk.f32.mxu1 %vm83_vm0, %v53_v23 }
  0x1e   :  { %1096 = vmatmul.mubr.msk.f32.gmra.mxu0 %vm83_vm0, %v22_v24 }
  0x1f   :  { %1098 = vmatprep.mubr.msk.f32.mxu0 %vm83_vm0, %v23_v25 }
  0x20   :  { %1144 = vmatmul.mubr.msk.f32.gmra.mxu1 %vm83_vm0, %v54_v26 }
  0x21   :  { %1146 = vmatprep.mubr.msk.f32.mxu1 %vm83_vm0, %v55_v27 }
  0x22   :  { %1099 = vmatmul.mubr.msk.f32.gmra.mxu0 %vm83_vm0, %v24_v28 }
  0x23   :  { %1101 = vmatprep.mubr.msk.f32.mxu0 %vm83_vm0, %v25_v29 }
  0x24   :  { %1147 = vmatmul.mubr.msk.f32.gmra.mxu1 %vm83_vm0, %v56_v30 }
  0x25   :  { %1149 = vmatprep.mubr.msk.f32.mxu1 %vm83_vm0, %v57_v31 }
  0x26   :  { %1102 = vmatmul.mubr.msk.f32.gmra.mxu0 %vm83_vm0, %v26_v32 }
  0x27   :  { %1104 = vmatprep.mubr.msk.f32.mxu0 %vm83_vm0, %v27_v33 }
  0x28   :  { %1150 = vmatmul.mubr.msk.f32.gmra.mxu1 %vm83_vm0, %v58_v34 }
  0x29   :  { %1152 = vmatprep.mubr.msk.f32.mxu1 %vm83_vm0, %v59_v35 }
  0x2a   :  { %1105 = vmatmul.mubr.msk.f32.gmra.mxu0 %vm83_vm0, %v28_v36 }
  0x2b   :  { %1107 = vmatprep.mubr.msk.f32.mxu0 %vm83_vm0, %v29_v37 }
  0x2c   :  { %1153 = vmatmul.mubr.msk.f32.gmra.mxu1 %vm83_vm0, %v60_v38 }
  0x2d   :  { %1155 = vmatprep.mubr.msk.f32.mxu1 %vm83_vm0, %v61_v39 }
  0x2e   :  { %1108 = vmatmul.mubr.msk.f32.gmra.mxu0 %vm83_vm0, %v30_v40 }
  0x2f   :  { %1110 = vmatprep.mubr.msk.f32.mxu0 %vm83_vm0, %v31_v41 }
  0x30   :  { %1156 = vmatmul.mubr.msk.f32.gmra.mxu1 %vm83_vm0, %v62_v42 }
  0x31   :  { %1158 = vmatprep.mubr.msk.f32.mxu1 %vm83_vm0, %v63_v43 }
  0x32   :  { %1111 = vmatmul.mubr.msk.f32.gmra.mxu0 %vm83_vm0, %v32_v44 }
  0x33   :  { %1113 = vmatprep.mubr.msk.f32.mxu0 %vm83_vm0, %v33_v45 }
  0x34   :  { %1159 = vmatmul.mubr.msk.f32.gmra.mxu1 %vm83_vm0, %v64_v46 }
  0x35   :  { %1161 = vmatprep.mubr.msk.f32.mxu1 %vm83_vm0, %v65_v47 }
  0x36   :  { %1114 = vmatmul.mubr.msk.f32.gmra.mxu0 %vm83_vm0, %v34_v48 }
  0x37   :  { %1116 = vmatprep.mubr.msk.f32.mxu0 %vm83_vm0, %v35_v49 }
  0x38   :  { %1162 = vmatmul.mubr.msk.f32.gmra.mxu1 %vm83_vm0, %v66_v50 }
  0x39   :  { %1164 = vmatprep.mubr.msk.f32.mxu1 %vm83_vm0, %v67_v51 }
  0x3a   :  { %1117 = vmatmul.mubr.msk.f32.gmra.mxu0 %vm83_vm0, %v36_v52 }
  0x3b   :  { %1119 = vmatprep.mubr.msk.f32.mxu0 %vm83_vm0, %v37_v53 }
  0x3c   :  { %1165 = vmatmul.mubr.msk.f32.gmra.mxu1 %vm83_vm0, %v68_v54 }
  0x3d   :  { %1167 = vmatprep.mubr.msk.f32.mxu1 %vm83_vm0, %v69_v55 }
  0x3e   :  { %1120 = vmatmul.mubr.msk.f32.gmra.mxu0 %vm83_vm0, %v38_v56 }
  0x3f   :  { %1122 = vmatprep.mubr.msk.f32.mxu0 %vm83_vm0, %v39_v57 }
  0x40   :  { %1168 = vmatmul.mubr.msk.f32.gmra.mxu1 %vm83_vm0, %v70_v58 }
  0x41   :  { %1170 = vmatprep.mubr.msk.f32.mxu1 %vm83_vm0, %v71_v59 }
  0x42   :  { %1123 = vmatmul.mubr.msk.f32.gmra.mxu0 %vm83_vm0, %v40_v60 }
  0x43   :  { %1125 = vmatprep.mubr.msk.f32.mxu0 %vm83_vm0, %v41_v61 }
  0x44   :  { %1171 = vmatmul.mubr.msk.f32.gmra.mxu1 %vm83_vm0, %v72_v62 }
  0x45   :  { %1173 = vmatprep.mubr.msk.f32.mxu1 %vm83_vm0, %v73_v63 }
  0x46   :  { %1126 = vmatmul.mubr.msk.f32.gmra.mxu0 %vm83_vm0, %v42_v0 }
  0x47   :  { %1128 = vmatprep.mubr.msk.f32.mxu0 %vm83_vm0, %v43_v1 }
  0x48   :  { %1174 = vmatmul.mubr.msk.f32.gmra.mxu1 %vm83_vm0, %v74_v2 }
  0x49   :  { %1176 = vmatprep.mubr.msk.f32.mxu1 %vm83_vm0, %v75_v3 }
  0x4a   :  { %1129 = vmatmul.mubr.msk.f32.gmra.mxu0 %vm83_vm0, %v44_v4 }
  0x4c   :  { %1177 = vmatmul.mubr.msk.f32.gmra.mxu1 %vm83_vm0, %v76_v5 }
  0xce   :  { %v1085_v6 = vpop.f32.mrf.mxu0 }
  0xcf   :  { %662 = vst [vmem:[%s1877_s2 + $0x8] sm:$0xff] %v1085_v6  ;;  %v796_v12 = vmul.f32 %v1085_v6, %v1085_v6 }
  0xd0   :  { %v342_v7 = vpop.f32.mrf.mxu0  ;;  %v1488_v8 = vpop.f32.mrf.mxu1 }
  0xd1   :  { %661 = vst [vmem:[%s1877_s2] sm:$0xff] %v342_v7  ;;  %v795_v9 = vmul.f32 %v342_v7, %v342_v7  ;;  %694 = vst [vmem:[%s1877_s2 + $0x108] sm:$0xff] %v1488_v8  ;;  %v725_v13 = vadd.f32 %v1085_v6, %v342_v7 }
  0xd2   :  { %v1088_v10 = vpop.f32.mrf.mxu0  ;;  %v1497_v11 = vpop.f32.mrf.mxu1 }
  0xd3   :  { %664 = vst [vmem:[%s1877_s2 + $0x18] sm:$0xff] %v1088_v10  ;;  %693 = vst [vmem:[%s1877_s2 + $0x100] sm:$0xff] %v1497_v11  ;;  %v859_v16 = vadd.f32 %v796_v12, %v795_v9  ;;  %v798_v21 = vmul.f32 %v1088_v10, %v1088_v10 }
  0xd4   :  { %v352_v14 = vpop.f32.mrf.mxu0  ;;  %v1506_v15 = vpop.f32.mrf.mxu1 }
  0xd5   :  { %663 = vst [vmem:[%s1877_s2 + $0x10] sm:$0xff] %v352_v14  ;;  %v726_v17 = vadd.f32 %v725_v13, %v352_v14  ;;  %v797_v18 = vmul.f32 %v352_v14, %v352_v14  ;;  %696 = vst [vmem:[%s1877_s2 + $0x118] sm:$0xff] %v1506_v15 }
  0xd6   :  { %v1091_v19 = vpop.f32.mrf.mxu0  ;;  %v1515_v20 = vpop.f32.mrf.mxu1 }
  0xd7   :  { %v860_v22 = vadd.f32 %v859_v16, %v797_v18  ;;  %666 = vst [vmem:[%s1877_s2 + $0x28] sm:$0xff] %v1091_v19  ;;  %v727_v23 = vadd.f32 %v1088_v10, %v726_v17  ;;  %695 = vst [vmem:[%s1877_s2 + $0x110] sm:$0xff] %v1515_v20  ;;  %v800_v31 = vmul.f32 %v1091_v19, %v1091_v19 }
  0xd8   :  { %v362_v24 = vpop.f32.mrf.mxu0  ;;  %v1524_v25 = vpop.f32.mrf.mxu1 }
  0xd9   :  { %665 = vst [vmem:[%s1877_s2 + $0x20] sm:$0xff] %v362_v24  ;;  %v728_v26 = vadd.f32 %v727_v23, %v362_v24  ;;  %v799_v27 = vmul.f32 %v362_v24, %v362_v24  ;;  %v861_v28 = vadd.f32 %v860_v22, %v798_v21  ;;  %698 = vst [vmem:[%s1877_s2 + $0x128] sm:$0xff] %v1524_v25 }
  0xda   :  { %v1094_v29 = vpop.f32.mrf.mxu0  ;;  %v1533_v30 = vpop.f32.mrf.mxu1 }
  0xdb   :  { %v862_v32 = vadd.f32 %v861_v28, %v799_v27  ;;  %668 = vst [vmem:[%s1877_s2 + $0x38] sm:$0xff] %v1094_v29  ;;  %v729_v33 = vadd.f32 %v1091_v19, %v728_v26  ;;  %697 = vst [vmem:[%s1877_s2 + $0x120] sm:$0xff] %v1533_v30  ;;  %v802_v41 = vmul.f32 %v1094_v29, %v1094_v29 }
  0xdc   :  { %v372_v34 = vpop.f32.mrf.mxu0  ;;  %v1542_v35 = vpop.f32.mrf.mxu1 }
  0xdd   :  { %667 = vst [vmem:[%s1877_s2 + $0x30] sm:$0xff] %v372_v34  ;;  %v730_v36 = vadd.f32 %v729_v33, %v372_v34  ;;  %v801_v37 = vmul.f32 %v372_v34, %v372_v34  ;;  %v863_v38 = vadd.f32 %v862_v32, %v800_v31  ;;  %700 = vst [vmem:[%s1877_s2 + $0x138] sm:$0xff] %v1542_v35 }
  0xde   :  { %v1097_v39 = vpop.f32.mrf.mxu0  ;;  %v1551_v40 = vpop.f32.mrf.mxu1 }
  0xdf   :  { %v864_v42 = vadd.f32 %v863_v38, %v801_v37  ;;  %670 = vst [vmem:[%s1877_s2 + $0x48] sm:$0xff] %v1097_v39  ;;  %v731_v43 = vadd.f32 %v1094_v29, %v730_v36  ;;  %699 = vst [vmem:[%s1877_s2 + $0x130] sm:$0xff] %v1551_v40  ;;  %v804_v51 = vmul.f32 %v1097_v39, %v1097_v39 }
  0xe0   :  { %v382_v44 = vpop.f32.mrf.mxu0  ;;  %v1560_v45 = vpop.f32.mrf.mxu1 }
  0xe1   :  { %669 = vst [vmem:[%s1877_s2 + $0x40] sm:$0xff] %v382_v44  ;;  %v732_v46 = vadd.f32 %v731_v43, %v382_v44  ;;  %v803_v47 = vmul.f32 %v382_v44, %v382_v44  ;;  %v865_v48 = vadd.f32 %v864_v42, %v802_v41  ;;  %702 = vst [vmem:[%s1877_s2 + $0x148] sm:$0xff] %v1560_v45 }
  0xe2   :  { %v1100_v49 = vpop.f32.mrf.mxu0  ;;  %v1569_v50 = vpop.f32.mrf.mxu1 }
  0xe3   :  { %v866_v52 = vadd.f32 %v865_v48, %v803_v47  ;;  %672 = vst [vmem:[%s1877_s2 + $0x58] sm:$0xff] %v1100_v49  ;;  %v733_v53 = vadd.f32 %v1097_v39, %v732_v46  ;;  %701 = vst [vmem:[%s1877_s2 + $0x140] sm:$0xff] %v1569_v50  ;;  %v806_v61 = vmul.f32 %v1100_v49, %v1100_v49 }
  0xe4   :  { %v392_v54 = vpop.f32.mrf.mxu0  ;;  %v1578_v55 = vpop.f32.mrf.mxu1 }
  0xe5   :  { %671 = vst [vmem:[%s1877_s2 + $0x50] sm:$0xff] %v392_v54  ;;  %v734_v56 = vadd.f32 %v733_v53, %v392_v54  ;;  %v805_v57 = vmul.f32 %v392_v54, %v392_v54  ;;  %v867_v58 = vadd.f32 %v866_v52, %v804_v51  ;;  %704 = vst [vmem:[%s1877_s2 + $0x158] sm:$0xff] %v1578_v55 }
  0xe6   :  { %v1103_v59 = vpop.f32.mrf.mxu0  ;;  %v1587_v60 = vpop.f32.mrf.mxu1 }
  0xe7   :  { %v868_v62 = vadd.f32 %v867_v58, %v805_v57  ;;  %674 = vst [vmem:[%s1877_s2 + $0x68] sm:$0xff] %v1103_v59  ;;  %v735_v63 = vadd.f32 %v1100_v49, %v734_v56  ;;  %703 = vst [vmem:[%s1877_s2 + $0x150] sm:$0xff] %v1587_v60  ;;  %v808_v7 = vmul.f32 %v1103_v59, %v1103_v59 }
  0xe8   :  { %v402_v0 = vpop.f32.mrf.mxu0  ;;  %v1596_v1 = vpop.f32.mrf.mxu1 }
  0xe9   :  { %673 = vst [vmem:[%s1877_s2 + $0x60] sm:$0xff] %v402_v0  ;;  %v736_v2 = vadd.f32 %v735_v63, %v402_v0  ;;  %v807_v3 = vmul.f32 %v402_v0, %v402_v0  ;;  %v869_v4 = vadd.f32 %v868_v62, %v806_v61  ;;  %706 = vst [vmem:[%s1877_s2 + $0x168] sm:$0xff] %v1596_v1 }
  0xea   :  { %v1106_v5 = vpop.f32.mrf.mxu0  ;;  %v1605_v6 = vpop.f32.mrf.mxu1 }
  0xeb   :  { %v870_v9 = vadd.f32 %v869_v4, %v807_v3  ;;  %676 = vst [vmem:[%s1877_s2 + $0x78] sm:$0xff] %v1106_v5  ;;  %v737_v10 = vadd.f32 %v1103_v59, %v736_v2  ;;  %705 = vst [vmem:[%s1877_s2 + $0x160] sm:$0xff] %v1605_v6  ;;  %v810_v21 = vmul.f32 %v1106_v5, %v1106_v5 }
  0xec   :  { %v412_v12 = vpop.f32.mrf.mxu0  ;;  %v1614_v13 = vpop.f32.mrf.mxu1 }
  0xed   :  { %675 = vst [vmem:[%s1877_s2 + $0x70] sm:$0xff] %v412_v12  ;;  %v738_v14 = vadd.f32 %v737_v10, %v412_v12  ;;  %v809_v16 = vmul.f32 %v412_v12, %v412_v12  ;;  %v871_v17 = vadd.f32 %v870_v9, %v808_v7  ;;  %708 = vst [vmem:[%s1877_s2 + $0x178] sm:$0xff] %v1614_v13 }
  0xee   :  { %v1109_v18 = vpop.f32.mrf.mxu0  ;;  %v1623_v19 = vpop.f32.mrf.mxu1 }
  0xef   :  { %v872_v22 = vadd.f32 %v871_v17, %v809_v16  ;;  %678 = vst [vmem:[%s1877_s2 + $0x88] sm:$0xff] %v1109_v18  ;;  %v739_v23 = vadd.f32 %v1106_v5, %v738_v14  ;;  %707 = vst [vmem:[%s1877_s2 + $0x170] sm:$0xff] %v1623_v19  ;;  %v812_v33 = vmul.f32 %v1109_v18, %v1109_v18 }
  0xf0   :  { %v422_v24 = vpop.f32.mrf.mxu0  ;;  %v1632_v26 = vpop.f32.mrf.mxu1 }
  0xf1   :  { %677 = vst [vmem:[%s1877_s2 + $0x80] sm:$0xff] %v422_v24  ;;  %v740_v27 = vadd.f32 %v739_v23, %v422_v24  ;;  %v811_v28 = vmul.f32 %v422_v24, %v422_v24  ;;  %v873_v29 = vadd.f32 %v872_v22, %v810_v21  ;;  %710 = vst [vmem:[%s1877_s2 + $0x188] sm:$0xff] %v1632_v26 }
  0xf2   :  { %v1112_v31 = vpop.f32.mrf.mxu0  ;;  %v1641_v32 = vpop.f32.mrf.mxu1 }
  0xf3   :  { %v874_v34 = vadd.f32 %v873_v29, %v811_v28  ;;  %680 = vst [vmem:[%s1877_s2 + $0x98] sm:$0xff] %v1112_v31  ;;  %v741_v36 = vadd.f32 %v1109_v18, %v740_v27  ;;  %709 = vst [vmem:[%s1877_s2 + $0x180] sm:$0xff] %v1641_v32  ;;  %v814_v46 = vmul.f32 %v1112_v31, %v1112_v31 }
  0xf4   :  { %v432_v37 = vpop.f32.mrf.mxu0  ;;  %v1650_v38 = vpop.f32.mrf.mxu1 }
  0xf5   :  { %679 = vst [vmem:[%s1877_s2 + $0x90] sm:$0xff] %v432_v37  ;;  %v742_v39 = vadd.f32 %v741_v36, %v432_v37  ;;  %v813_v41 = vmul.f32 %v432_v37, %v432_v37  ;;  %v875_v42 = vadd.f32 %v874_v34, %v812_v33  ;;  %712 = vst [vmem:[%s1877_s2 + $0x198] sm:$0xff] %v1650_v38 }
  0xf6   :  { %v1115_v43 = vpop.f32.mrf.mxu0  ;;  %v1659_v44 = vpop.f32.mrf.mxu1 }
  0xf7   :  { %v876_v47 = vadd.f32 %v875_v42, %v813_v41  ;;  %682 = vst [vmem:[%s1877_s2 + $0xa8] sm:$0xff] %v1115_v43  ;;  %v743_v48 = vadd.f32 %v1112_v31, %v742_v39  ;;  %711 = vst [vmem:[%s1877_s2 + $0x190] sm:$0xff] %v1659_v44  ;;  %v816_v58 = vmul.f32 %v1115_v43, %v1115_v43 }
  0xf8   :  { %v442_v49 = vpop.f32.mrf.mxu0  ;;  %v1668_v51 = vpop.f32.mrf.mxu1 }
  0xf9   :  { %681 = vst [vmem:[%s1877_s2 + $0xa0] sm:$0xff] %v442_v49  ;;  %v744_v52 = vadd.f32 %v743_v48, %v442_v49  ;;  %v815_v53 = vmul.f32 %v442_v49, %v442_v49  ;;  %v877_v54 = vadd.f32 %v876_v47, %v814_v46  ;;  %714 = vst [vmem:[%s1877_s2 + $0x1a8] sm:$0xff] %v1668_v51 }
  0xfa   :  { %v1118_v56 = vpop.f32.mrf.mxu0  ;;  %v1677_v57 = vpop.f32.mrf.mxu1 }
  0xfb   :  { %v878_v59 = vadd.f32 %v877_v54, %v815_v53  ;;  %684 = vst [vmem:[%s1877_s2 + $0xb8] sm:$0xff] %v1118_v56  ;;  %v745_v61 = vadd.f32 %v1115_v43, %v744_v52  ;;  %713 = vst [vmem:[%s1877_s2 + $0x1a0] sm:$0xff] %v1677_v57  ;;  %v818_v7 = vmul.f32 %v1118_v56, %v1118_v56 }
  0xfc   :  { %v452_v62 = vpop.f32.mrf.mxu0  ;;  %v1686_v63 = vpop.f32.mrf.mxu1 }
  0xfd   :  { %683 = vst [vmem:[%s1877_s2 + $0xb0] sm:$0xff] %v452_v62  ;;  %v746_v0 = vadd.f32 %v745_v61, %v452_v62  ;;  %v817_v2 = vmul.f32 %v452_v62, %v452_v62  ;;  %v879_v3 = vadd.f32 %v878_v59, %v816_v58  ;;  %716 = vst [vmem:[%s1877_s2 + $0x1b8] sm:$0xff] %v1686_v63 }
  0xfe   :  { %v1121_v4 = vpop.f32.mrf.mxu0  ;;  %v1695_v5 = vpop.f32.mrf.mxu1 }
  0xff   :  { %v880_v9 = vadd.f32 %v879_v3, %v817_v2  ;;  %686 = vst [vmem:[%s1877_s2 + $0xc8] sm:$0xff] %v1121_v4  ;;  %v747_v10 = vadd.f32 %v1118_v56, %v746_v0  ;;  %715 = vst [vmem:[%s1877_s2 + $0x1b0] sm:$0xff] %v1695_v5  ;;  %v820_v23 = vmul.f32 %v1121_v4, %v1121_v4 }
 0x100   :  { %v462_v12 = vpop.f32.mrf.mxu0  ;;  %v1704_v14 = vpop.f32.mrf.mxu1 }
 0x101   :  { %685 = vst [vmem:[%s1877_s2 + $0xc0] sm:$0xff] %v462_v12  ;;  %v748_v16 = vadd.f32 %v747_v10, %v462_v12  ;;  %v819_v17 = vmul.f32 %v462_v12, %v462_v12  ;;  %v881_v18 = vadd.f32 %v880_v9, %v818_v7  ;;  %718 = vst [vmem:[%s1877_s2 + $0x1c8] sm:$0xff] %v1704_v14 }
 0x102   :  { %v1124_v21 = vpop.f32.mrf.mxu0  ;;  %v1713_v22 = vpop.f32.mrf.mxu1 }
 0x103   :  { %v882_v24 = vadd.f32 %v881_v18, %v819_v17  ;;  %688 = vst [vmem:[%s1877_s2 + $0xd8] sm:$0xff] %v1124_v21  ;;  %v749_v27 = vadd.f32 %v1121_v4, %v748_v16  ;;  %717 = vst [vmem:[%s1877_s2 + $0x1c0] sm:$0xff] %v1713_v22  ;;  %v822_v39 = vmul.f32 %v1124_v21, %v1124_v21 }
 0x104   :  { %v472_v28 = vpop.f32.mrf.mxu0  ;;  %v1722_v29 = vpop.f32.mrf.mxu1  ;;  %v827_v16 = vmul.f32 %v1497_v11, %v1497_v11  ;;  %v828_v17 = vmul.f32 %v1488_v8, %v1488_v8 }
 0x105   :  { %687 = vst [vmem:[%s1877_s2 + $0xd0] sm:$0xff] %v472_v28  ;;  %v750_v31 = vadd.f32 %v749_v27, %v472_v28  ;;  %v821_v33 = vmul.f32 %v472_v28, %v472_v28  ;;  %v883_v34 = vadd.f32 %v882_v24, %v820_v23  ;;  %720 = vst [vmem:[%s1877_s2 + $0x1d8] sm:$0xff] %v1722_v29 }
 0x106   :  { %v1127_v36 = vpop.f32.mrf.mxu0  ;;  %v1731_v37 = vpop.f32.mrf.mxu1  ;;  %v829_v24 = vmul.f32 %v1515_v20, %v1515_v20  ;;  %v830_v28 = vmul.f32 %v1506_v15, %v1506_v15 }
 0x107   :  { %v884_v41 = vadd.f32 %v883_v34, %v821_v33  ;;  %690 = vst [vmem:[%s1877_s2 + $0xe8] sm:$0xff] %v1127_v36  ;;  %v751_v42 = vadd.f32 %v1124_v21, %v750_v31  ;;  %719 = vst [vmem:[%s1877_s2 + $0x1d0] sm:$0xff] %v1731_v37  ;;  %v824_v54 = vmul.f32 %v1127_v36, %v1127_v36 }
 0x108   :  { %v482_v43 = vpop.f32.mrf.mxu0  ;;  %v1740_v46 = vpop.f32.mrf.mxu1  ;;  %v831_v34 = vmul.f32 %v1533_v30, %v1533_v30 }
 0x109   :  { %689 = vst [vmem:[%s1877_s2 + $0xe0] sm:$0xff] %v482_v43  ;;  %v752_v47 = vadd.f32 %v751_v42, %v482_v43  ;;  %v823_v48 = vmul.f32 %v482_v43, %v482_v43  ;;  %v885_v49 = vadd.f32 %v884_v41, %v822_v39  ;;  %722 = vst [vmem:[%s1877_s2 + $0x1e8] sm:$0xff] %v1740_v46 }
 0x10a   :  { %v1130_v52 = vpop.f32.mrf.mxu0  ;;  %v1749_v53 = vpop.f32.mrf.mxu1  ;;  %v833_v42 = vmul.f32 %v1551_v40, %v1551_v40 }
 0x10b   :  { %v886_v56 = vadd.f32 %v885_v49, %v823_v48  ;;  %692 = vst [vmem:[%s1877_s2 + $0xf8] sm:$0xff] %v1130_v52  ;;  %v753_v58 = vadd.f32 %v1127_v36, %v752_v47  ;;  %721 = vst [vmem:[%s1877_s2 + $0x1e0] sm:$0xff] %v1749_v53  ;;  %v826_v4 = vmul.f32 %v1130_v52, %v1130_v52 }
 0x10c   :  { %v492_v59 = vpop.f32.mrf.mxu0  ;;  %v1758_v61 = vpop.f32.mrf.mxu1  ;;  %v835_v49 = vmul.f32 %v1569_v50, %v1569_v50 }
 0x10d   :  { %691 = vst [vmem:[%s1877_s2 + $0xf0] sm:$0xff] %v492_v59  ;;  %v754_v62 = vadd.f32 %v753_v58, %v492_v59  ;;  %v825_v0 = vmul.f32 %v492_v59, %v492_v59  ;;  %v887_v2 = vadd.f32 %v886_v56, %v824_v54  ;;  %724 = vst [vmem:[%s1877_s2 + $0x1f8] sm:$0xff] %v1758_v61 }
 0x10e   :  { %v1767_v3 = vpop.f32.mrf.mxu1  ;;  %v837_v58 = vmul.f32 %v1587_v60, %v1587_v60 }
 0x10f   :  { %v755_v7 = vadd.f32 %v1130_v52, %v754_v62  ;;  %v888_v9 = vadd.f32 %v887_v2, %v825_v0  ;;  %723 = vst [vmem:[%s1877_s2 + $0x1f0] sm:$0xff] %v1767_v3  ;;  %v839_v2 = vmul.f32 %v1605_v6, %v1605_v6 }
 0x111   :  { %v889_v10 = vadd.f32 %v888_v9, %v826_v4  ;;  %v756_v12 = vadd.f32 %v755_v7, %v1497_v11 }
 0x113   :  { %v890_v18 = vadd.f32 %v889_v10, %v827_v16  ;;  %v757_v21 = vadd.f32 %v1488_v8, %v756_v12  ;;  %v832_v8 = vmul.f32 %v1524_v25, %v1524_v25  ;;  %v841_v10 = vmul.f32 %v1623_v19, %v1623_v19 }
 0x115   :  { %v758_v23 = vadd.f32 %v757_v21, %v1515_v20  ;;  %v891_v27 = vadd.f32 %v890_v18, %v828_v17  ;;  %v843_v18 = vmul.f32 %v1641_v32, %v1641_v32 }
 0x117   :  { %v892_v31 = vadd.f32 %v891_v27, %v829_v24  ;;  %v759_v33 = vadd.f32 %v1506_v15, %v758_v23  ;;  %v834_v15 = vmul.f32 %v1542_v35, %v1542_v35  ;;  %v845_v27 = vmul.f32 %v1659_v44, %v1659_v44 }
 0x119   :  { %v760_v11 = vadd.f32 %v759_v33, %v1533_v30  ;;  %v893_v36 = vadd.f32 %v892_v31, %v830_v28 }
 0x11b   :  { %v894_v39 = vadd.f32 %v893_v36, %v831_v34  ;;  %v761_v41 = vadd.f32 %v1524_v25, %v760_v11  ;;  %v836_v25 = vmul.f32 %v1560_v45, %v1560_v45  ;;  %v847_v11 = vmul.f32 %v1677_v57, %v1677_v57 }
 0x11d   :  { %v762_v20 = vadd.f32 %v761_v41, %v1551_v40  ;;  %v895_v43 = vadd.f32 %v894_v39, %v832_v8  ;;  %v849_v39 = vmul.f32 %v1695_v5, %v1695_v5 }
 0x11f   :  { %v896_v47 = vadd.f32 %v895_v43, %v833_v42  ;;  %v763_v48 = vadd.f32 %v1542_v35, %v762_v20  ;;  %v838_v35 = vmul.f32 %v1578_v55, %v1578_v55  ;;  %v851_v43 = vmul.f32 %v1713_v22, %v1713_v22 }
 0x121   :  { %v764_v30 = vadd.f32 %v763_v48, %v1569_v50  ;;  %v897_v52 = vadd.f32 %v896_v47, %v834_v15 }
 0x123   :  { %v898_v54 = vadd.f32 %v897_v52, %v835_v49  ;;  %v765_v56 = vadd.f32 %v1560_v45, %v764_v30  ;;  %v840_v45 = vmul.f32 %v1596_v1, %v1596_v1  ;;  %v853_v30 = vmul.f32 %v1731_v37, %v1731_v37 }
 0x125   :  { %v766_v40 = vadd.f32 %v765_v56, %v1587_v60  ;;  %v899_v59 = vadd.f32 %v898_v54, %v836_v25  ;;  %v855_v54 = vmul.f32 %v1749_v53, %v1749_v53 }
 0x127   :  { %v900_v62 = vadd.f32 %v899_v59, %v837_v58  ;;  %v767_v0 = vadd.f32 %v1578_v55, %v766_v40  ;;  %v842_v55 = vmul.f32 %v1614_v13, %v1614_v13  ;;  %v857_v59 = vmul.f32 %v1767_v3, %v1767_v3 }
 0x129   :  { %v768_v50 = vadd.f32 %v767_v0, %v1605_v6  ;;  %v901_v4 = vadd.f32 %v900_v62, %v838_v35 }
 0x12b   :  { %v902_v7 = vadd.f32 %v901_v4, %v839_v2  ;;  %v769_v9 = vadd.f32 %v1596_v1, %v768_v50  ;;  %v844_v1 = vmul.f32 %v1632_v26, %v1632_v26 }
 0x12d   :  { %v770_v60 = vadd.f32 %v769_v9, %v1623_v19  ;;  %v903_v12 = vadd.f32 %v902_v7, %v840_v45 }
 0x12f   :  { %v904_v16 = vadd.f32 %v903_v12, %v841_v10  ;;  %v771_v17 = vadd.f32 %v1614_v13, %v770_v60  ;;  %v846_v13 = vmul.f32 %v1650_v38, %v1650_v38 }
 0x131   :  { %v772_v6 = vadd.f32 %v771_v17, %v1641_v32  ;;  %v905_v21 = vadd.f32 %v904_v16, %v842_v55 }
 0x133   :  { %v906_v23 = vadd.f32 %v905_v21, %v843_v18  ;;  %v773_v24 = vadd.f32 %v1632_v26, %v772_v6  ;;  %v848_v26 = vmul.f32 %v1668_v51, %v1668_v51 }
 0x135   :  { %v774_v19 = vadd.f32 %v773_v24, %v1659_v44  ;;  %v907_v28 = vadd.f32 %v906_v23, %v844_v1 }
 0x137   :  { %v908_v31 = vadd.f32 %v907_v28, %v845_v27  ;;  %v775_v33 = vadd.f32 %v1650_v38, %v774_v19  ;;  %v850_v38 = vmul.f32 %v1686_v63, %v1686_v63 }
 0x139   :  { %v776_v32 = vadd.f32 %v775_v33, %v1677_v57  ;;  %v909_v34 = vadd.f32 %v908_v31, %v846_v13 }
 0x13b   :  { %v910_v36 = vadd.f32 %v909_v34, %v847_v11  ;;  %v777_v8 = vadd.f32 %v1668_v51, %v776_v32  ;;  %v852_v51 = vmul.f32 %v1704_v14, %v1704_v14 }
 0x13d   :  { %v778_v44 = vadd.f32 %v777_v8, %v1695_v5  ;;  %v911_v41 = vadd.f32 %v910_v36, %v848_v26 }
 0x13f   :  { %v912_v20 = vadd.f32 %v911_v41, %v849_v39  ;;  %v779_v42 = vadd.f32 %v1686_v63, %v778_v44  ;;  %v854_v63 = vmul.f32 %v1722_v29, %v1722_v29 }
 0x141   :  { %v780_v57 = vadd.f32 %v779_v42, %v1713_v22  ;;  %v913_v15 = vadd.f32 %v912_v20, %v850_v38 }
 0x143   :  { %v914_v47 = vadd.f32 %v913_v15, %v851_v43  ;;  %v781_v48 = vadd.f32 %v1704_v14, %v780_v57  ;;  %v856_v14 = vmul.f32 %v1740_v46, %v1740_v46 }
 0x145   :  { %v782_v5 = vadd.f32 %v781_v48, %v1731_v37  ;;  %v915_v49 = vadd.f32 %v914_v47, %v852_v51 }
 0x147   :  { %v916_v52 = vadd.f32 %v915_v49, %v853_v30  ;;  %v783_v25 = vadd.f32 %v1722_v29, %v782_v5  ;;  %v858_v29 = vmul.f32 %v1758_v61, %v1758_v61 }
 0x149   :  { %v784_v22 = vadd.f32 %v783_v25, %v1749_v53  ;;  %v917_v56 = vadd.f32 %v916_v52, %v854_v63 }
 0x14b   :  { %v918_v40 = vadd.f32 %v917_v56, %v855_v54  ;;  %v785_v58 = vadd.f32 %v1740_v46, %v784_v22 }
 0x14d   :  { %v786_v37 = vadd.f32 %v785_v58, %v1767_v3  ;;  %v919_v35 = vadd.f32 %v918_v40, %v856_v14 }
 0x14f   :  { %v787_v62 = vadd.f32 %v1758_v61, %v786_v37  ;;  %v920_v0 = vadd.f32 %v919_v35, %v857_v59 }
 0x151   :  { %v788_v53 = vrot.slane %v787_v62, 4  ;;  %v921_v50 = vadd.f32 %v920_v0, %v858_v29 }
 0x153   :  { %v789_v2 = vadd.f32 %v788_v53, %v787_v62  ;;  %v922_v4 = vrot.slane %v921_v50, 4 }
 0x155   :  { %v790_v45 = vrot.slane %v789_v2, 2  ;;  %v923_v7 = vadd.f32 %v922_v4, %v921_v50 }
 0x157   :  { %v791_v9 = vadd.f32 %v790_v45, %v789_v2  ;;  %v924_v46 = vrot.slane %v923_v7, 2 }
 0x159   :  { %v792_v60 = vrot.slane %v791_v9, 1  ;;  %v925_v10 = vadd.f32 %v924_v46, %v923_v7 }
 0x15b   :  { %v793_v12 = vadd.f32 %v792_v60, %v791_v9  ;;  %v926_v55 = vrot.slane %v925_v10, 1 }
 0x15d   :  { %794 = vst [vmem:[%s1878_s3] sm:$0x1] %v793_v12  ;;  %v927_v3 = vadd.f32 %v926_v55, %v925_v10 }
 0x15f   :  { %928 = vst [vmem:[%s1878_s3 + $0x1] sm:$0x1] %v927_v3 }

</bundles_post_ra>
